<compile_context>
chip_gen: v7x
topology: tpu7x:2x2x1
jax: 0.10.0
libtpu: 0.0.40
codegen_flags: <defaults>
</compile_context>

<pallas_src>
import numpy as np
import jax
import jax.numpy as jnp
from jax import lax
from jax.experimental import pallas as pl
from jax.experimental.pallas import tpu as pltpu


# ---------------------------------------------------------------------------
# Kernel: full Encoder forward for one batch tile.
# ---------------------------------------------------------------------------
def encoder_kernel(x_ref, w1_ref, w2_ref, wf1_ref, wf2_ref, wf3_ref, b_ref,
                   o_ref):
    """
    x_ref:   [TB, 256]   flattened 1x16x16 input (f32 in HBM)
    w1_ref:  [256, 1024] conv1 as matmul; 4 pool-offset chunks of 256 cols
    w2_ref:  [256, 512]  conv2 as matmul; 4 pool-offset chunks of 128 cols
    wf*_ref: fc weights zero-padded to 128 lanes (wf3 padded to 128 out lanes)
    b_ref:   [8, 256]    packed per-layer biases (f32)
    o_ref:   [TB, 128]   lane-dense output; caller slices [:, :64]
    """
    mm = w1_ref.dtype                       # bf16 (default) or f32
    f32 = jnp.float32
    bias = b_ref[...]
    x = x_ref[...].astype(mm)               # in-kernel cast, free under MXU work

    # conv1 (5x5, 1->6) + bias + ReLU + 2x2 maxpool.
    # Pool == running elementwise max of the four pool-offset chunk dots
    # (bias is identical across chunks, so max/+bias/ReLU commute).
    m1 = jnp.dot(x, w1_ref[:, 0:256], preferred_element_type=f32)
    for c in range(1, 4):
        m1 = jnp.maximum(m1, jnp.dot(x, w1_ref[:, c * 256:(c + 1) * 256],
                                     preferred_element_type=f32))
    p1 = jnp.maximum(m1 + bias[0:1, :], 0.0).astype(mm)          # [TB, 256]

    # conv2 (5x5, 6->16) + bias + ReLU + 2x2 maxpool, same trick (128-wide chunks).
    m2 = jnp.dot(p1, w2_ref[:, 0:128], preferred_element_type=f32)
    for c in range(1, 4):
        m2 = jnp.maximum(m2, jnp.dot(p1, w2_ref[:, c * 128:(c + 1) * 128],
                                     preferred_element_type=f32))
    p2 = jnp.maximum(m2 + bias[1:2, 0:128], 0.0).astype(mm)      # [TB, 128]

    # fc1 -> fc2 -> fc3, each + bias + ReLU (all zero-padded to 128 lanes).
    f1 = jnp.maximum(jnp.dot(p2, wf1_ref[...], preferred_element_type=f32)
                     + bias[2:3, 0:128], 0.0).astype(mm)
    f2 = jnp.maximum(jnp.dot(f1, wf2_ref[...], preferred_element_type=f32)
                     + bias[3:4, 0:128], 0.0).astype(mm)
    f3 = jnp.maximum(jnp.dot(f2, wf3_ref[...], preferred_element_type=f32)
                     + bias[4:5, 0:128], 0.0)                     # [TB, 128]

    o_ref[...] = f3.astype(o_ref.dtype)     # lane-dense (128-wide) store


# ---------------------------------------------------------------------------
# One-time host-side parameter preprocessing: conv -> matmul, lane padding,
# bias packing.  PyTorch layouts in, Pallas-friendly layouts out.
# ---------------------------------------------------------------------------
def build_params(w1, b1, w2, b2, wf1, bf1, wf2, bf2, wf3, bf3,
                 dtype=jnp.bfloat16):
    w1 = np.asarray(w1, np.float32); b1 = np.asarray(b1, np.float32)
    w2 = np.asarray(w2, np.float32); b2 = np.asarray(b2, np.float32)
    wf1 = np.asarray(wf1, np.float32); bf1 = np.asarray(bf1, np.float32)
    wf2 = np.asarray(wf2, np.float32); bf2 = np.asarray(bf2, np.float32)
    wf3 = np.asarray(wf3, np.float32); bf3 = np.asarray(bf3, np.float32)

    # conv1: input 1x16x16 (row-major r = i*16 + j), output 6x12x12.
    # Chunk (a,b) in {0,1}^2 at column offset (2a+b)*256; within a chunk
    # col = c*36 + pi*6 + pj, holding conv output at (2*pi+a, 2*pj+b).
    # Cols 216..255 of each chunk are zero padding.  Bias is per-channel,
    # identical across chunks -> store a single 256-wide bias row.
    W1 = np.zeros((256, 4 * 256), np.float32)
    B1c = np.zeros((256,), np.float32)
    for c in range(6):
        for pi in range(6):
            for pj in range(6):
                B1c[c * 36 + pi * 6 + pj] = b1[c]
    for a in range(2):
        for b in range(2):
            base = (2 * a + b) * 256
            for c in range(6):
                for pi in range(6):
                    for pj in range(6):
                        col = base + c * 36 + pi * 6 + pj
                        i0, j0 = 2 * pi + a, 2 * pj + b
                        for di in range(5):
                            for dj in range(5):
                                W1[(i0 + di) * 16 + (j0 + dj), col] = \
                                    w1[c, 0, di, dj]

    # conv2: input 6x6x6 (rows r = cin*36 + i*6 + j, rows 216..255 zero),
    # output 16x2x2.  Chunk (a,b) = output position, col = (2a+b)*128 + cout;
    # cols 16..127 of each chunk are zero padding.
    W2 = np.zeros((256, 4 * 128), np.float32)
    B2c = np.zeros((128,), np.float32)
    B2c[:16] = b2
    for a in range(2):
        for b in range(2):
            base = (2 * a + b) * 128
            for co in range(16):
                for ci in range(6):
                    for di in range(5):
                        for dj in range(5):
                            W2[ci * 36 + (a + di) * 6 + (b + dj), base + co] = \
                                w2[co, ci, di, dj]

    # FC layers: pre-transposed to [in, out], zero-padded to 128 lanes.
    # WF3 is padded to 128 OUTPUT lanes too, so the final store is lane-dense.
    WF1 = np.zeros((128, 128), np.float32); WF1[:16, :120] = wf1.T
    WF2 = np.zeros((128, 128), np.float32); WF2[:120, :84] = wf2.T
    WF3 = np.zeros((128, 128), np.float32); WF3[:84, :64] = wf3.T

    biases = np.zeros((8, 256), np.float32)
    biases[0, :256] = B1c
    biases[1, :128] = B2c
    biases[2, :120] = bf1
    biases[3, :84] = bf2
    biases[4, :64] = bf3

    return dict(
        w1=jnp.asarray(W1, dtype), w2=jnp.asarray(W2, dtype),
        wf1=jnp.asarray(WF1, dtype), wf2=jnp.asarray(WF2, dtype),
        wf3=jnp.asarray(WF3, dtype), biases=jnp.asarray(biases, jnp.float32))


# ---------------------------------------------------------------------------
# Wrapper
# ---------------------------------------------------------------------------
def _round_up(n, m):
    return ((n + m - 1) // m) * m


def _cdiv(a, b):
    return -(-a // b)


def encoder_forward(x, params, *, batch_tile=1024):
    """x: [B, 1, 16, 16] float32 -> [B, 64] float32."""
    B = x.shape[0]
    xf = x.reshape(B, 256)                       # free reshape, dtype untouched
    sub = max(8, 32 // xf.dtype.itemsize)        # sublane multiple for x's dtype

    # Batch tile: large (amortize ~0.35us/step overhead), sublane-aligned
    # (or equal to the full batch), split into >=2 blocks when the batch
    # allows it so both v7x TensorCores get work.
    if batch_tile >= B:
        TB = B                                   # single full-dim block
    else:
        TB = _round_up(batch_tile, sub)
    nb = _cdiv(B, TB)
    if nb == 1 and B > sub:
        TB = _round_up(_cdiv(B, 2), sub)
        nb = _cdiv(B, TB)

    wkeys = ('w1', 'w2', 'wf1', 'wf2', 'wf3', 'biases')
    w_bytes = sum(int(params[k].size) * params[k].dtype.itemsize for k in wkeys)
    flops = int(2 * B * (4 * 256 * 256 + 4 * 256 * 128 + 3 * 128 * 128))
    bytes_accessed = int(xf.size * xf.dtype.itemsize + B * 128 * 4 + w_bytes)

    # Scoped VMEM: x/out double buffers + single-buffered constants + generous
    # f32-intermediate headroom.  Matters on v5e (16 MiB default) at large TB.
    vmem_need = (2 * TB * 256 * xf.dtype.itemsize + 2 * TB * 128 * 4
                 + w_bytes + 8 * TB * 256 * 4)
    vmem_limit = int(min(max(vmem_need, 32 << 20), 64 << 20))

    const = lambda i: (0, 0)
    single = pl.Buffered(1)                      # constants: no 2x buffering

    out = pl.pallas_call(
        encoder_kernel,
        out_shape=jax.ShapeDtypeStruct((B, 128), jnp.float32),
        grid=(nb,),
        in_specs=[
            pl.BlockSpec((TB, 256), lambda i: (i, 0)),
            pl.BlockSpec(params['w1'].shape, const, pipeline_mode=single),
            pl.BlockSpec(params['w2'].shape, const, pipeline_mode=single),
            pl.BlockSpec(params['wf1'].shape, const, pipeline_mode=single),
            pl.BlockSpec(params['wf2'].shape, const, pipeline_mode=single),
            pl.BlockSpec(params['wf3'].shape, const, pipeline_mode=single),
            pl.BlockSpec(params['biases'].shape, const, pipeline_mode=single),
        ],
        out_specs=pl.BlockSpec((TB, 128), lambda i: (i, 0)),
        compiler_params=pltpu.CompilerParams(
            dimension_semantics=("parallel",),
            vmem_limit_bytes=vmem_limit),
        cost_estimate=pl.CostEstimate(flops=flops, transcendentals=0,
                                      bytes_accessed=bytes_accessed),
    )(xf, params['w1'], params['w2'], params['wf1'], params['wf2'],
      params['wf3'], params['biases'])
    return out[:, :64]


# ---------------------------------------------------------------------------
# Pure-JAX reference (mirrors the PyTorch module exactly)
# ---------------------------------------------------------------------------
def _maxpool2(h):
    B, C, H, W = h.shape
    return h.reshape(B, C, H // 2, 2, W // 2, 2).max(axis=(3, 5))


def encoder_reference(x, raw):
    w1, b1, w2, b2, wf1, bf1, wf2, bf2, wf3, bf3 = raw
    dn = ('NCHW', 'OIHW', 'NCHW')
    h = lax.conv_general_dilated(x, w1, (1, 1), 'VALID', dimension_numbers=dn)
    h = _maxpool2(jnp.maximum(h + b1[None, :, None, None], 0.0))
    h = lax.conv_general_dilated(h, w2, (1, 1), 'VALID', dimension_numbers=dn)
    h = _maxpool2(jnp.maximum(h + b2[None, :, None, None], 0.0))
    h = h.reshape(h.shape[0], -1)
    h = jnp.maximum(h @ wf1.T + bf1, 0.0)
    h = jnp.maximum(h @ wf2.T + bf2, 0.0)
    h = jnp.maximum(h @ wf3.T + bf3, 0.0)
    return h


# ---------------------------------------------------------------------------
if __name__ == "__main__":
    key = jax.random.PRNGKey(0)
    ks = jax.random.split(key, 12)

    B = 2
    x = jax.random.normal(ks[0], (B, 1, 16, 16), dtype=jnp.float32)

    def uinit(k, shape, fan_in):
        bound = 1.0 / np.sqrt(fan_in)
        return jax.random.uniform(k, shape, jnp.float32, -bound, bound)

    w1 = uinit(ks[1], (6, 1, 5, 5), 25);    b1 = uinit(ks[2], (6,), 25)
    w2 = uinit(ks[3], (16, 6, 5, 5), 150);  b2 = uinit(ks[4], (16,), 150)
    wf1 = uinit(ks[5], (120, 16), 16);      bf1 = uinit(ks[6], (120,), 16)
    wf2 = uinit(ks[7], (84, 120), 120);     bf2 = uinit(ks[8], (84,), 120)
    wf3 = uinit(ks[9], (64, 84), 84);       bf3 = uinit(ks[10], (64,), 84)
    raw = (w1, b1, w2, b2, wf1, bf1, wf2, bf2, wf3, bf3)

    ref = encoder_reference(x, raw)

    # f32 path: strict numerical check (single full-batch block).
    params32 = build_params(*raw, dtype=jnp.float32)
    out = jax.block_until_ready(encoder_forward(x, params32))
    assert out.shape == (B, 64), out.shape
    err = float(jnp.max(jnp.abs(out - ref)))
    assert jnp.allclose(out, ref, atol=1e-4, rtol=1e-4), err

    # Multi-block grid + partial last block (B=40, tile=16), still f32 strict.
    xb = jax.random.normal(ks[11], (40, 1, 16, 16), dtype=jnp.float32)
    refb = encoder_reference(xb, raw)
    outb = jax.block_until_ready(encoder_forward(xb, params32, batch_tile=16))
    assert outb.shape == (40, 64), outb.shape
    errb = float(jnp.max(jnp.abs(outb - refb)))
    assert jnp.allclose(outb, refb, atol=1e-4, rtol=1e-4), errb

    # Default path: bf16 MXU operands (in-kernel cast), loose check.
    params16 = build_params(*raw)
    out16 = jax.block_until_ready(encoder_forward(x, params16))
    err16 = float(jnp.max(jnp.abs(out16 - ref)))
    assert err16 < 0.1, err16

    # Default tile size / two-block split path on the larger batch (bf16).
    outb16 = jax.block_until_ready(encoder_forward(xb, params16))
    errb16 = float(jnp.max(jnp.abs(outb16 - refb)))
    assert errb16 < 0.1, errb16

    print("KERNEL_OK")
</pallas_src>

<mosaic_0001>
module attributes {stable_mosaic.version = 11 : i64} {
  func.func @encoder_kernel(%arg0: i32, %arg1: memref<2x256xf32, #tpu.memory_space<vmem>>, %arg2: memref<256x1024xf32, #tpu.memory_space<vmem>>, %arg3: memref<256x512xf32, #tpu.memory_space<vmem>>, %arg4: memref<128x128xf32, #tpu.memory_space<vmem>>, %arg5: memref<128x128xf32, #tpu.memory_space<vmem>>, %arg6: memref<128x128xf32, #tpu.memory_space<vmem>>, %arg7: memref<8x256xf32, #tpu.memory_space<vmem>>, %arg8: memref<2x128xf32, #tpu.memory_space<vmem>>) attributes {dimension_semantics = [#tpu.dimension_semantics<parallel>], iteration_bounds = array<i64: 1>, scalar_prefetch = 0 : i64, scratch_operands = 0 : i64, tpu.core_type = #tpu.core_type<tc>, window_params = [{transform_indices = @transform_0, window_bounds = array<i64: 2, 256>}, {pipeline_mode = #tpu.pipeline_mode<synchronous>, transform_indices = @transform_1, window_bounds = array<i64: 256, 1024>}, {pipeline_mode = #tpu.pipeline_mode<synchronous>, transform_indices = @transform_2, window_bounds = array<i64: 256, 512>}, {pipeline_mode = #tpu.pipeline_mode<synchronous>, transform_indices = @transform_3, window_bounds = array<i64: 128, 128>}, {pipeline_mode = #tpu.pipeline_mode<synchronous>, transform_indices = @transform_4, window_bounds = array<i64: 128, 128>}, {pipeline_mode = #tpu.pipeline_mode<synchronous>, transform_indices = @transform_5, window_bounds = array<i64: 128, 128>}, {pipeline_mode = #tpu.pipeline_mode<synchronous>, transform_indices = @transform_6, window_bounds = array<i64: 8, 256>}, {transform_indices = @transform_7, window_bounds = array<i64: 2, 128>}]} {
    %c0 = arith.constant 0 : index
    %c0_0 = arith.constant 0 : index
    %0 = vector.load %arg7[%c0, %c0_0] : memref<8x256xf32, #tpu.memory_space<vmem>>, vector<8x256xf32>
    %c0_1 = arith.constant 0 : index
    %c0_2 = arith.constant 0 : index
    %1 = vector.load %arg1[%c0_1, %c0_2] : memref<2x256xf32, #tpu.memory_space<vmem>>, vector<2x256xf32>
    %c0_3 = arith.constant 0 : index
    %c0_4 = arith.constant 0 : index
    %2 = vector.load %arg2[%c0_3, %c0_4] : memref<256x1024xf32, #tpu.memory_space<vmem>>, vector<256x256xf32>
    %cst = arith.constant dense<0.000000e+00> : vector<2x256xf32>
    %3 = tpu.matmul %1, %2, %cst {dimension_numbers = #tpu.dot_dimension_numbers<[1], [0], [0], [1], [0, 0, 1, 1], [], []>} : vector<2x256xf32>, vector<256x256xf32>, vector<2x256xf32> -> vector<2x256xf32>
    %c0_5 = arith.constant 0 : index
    %c256 = arith.constant 256 : index
    %4 = vector.load %arg2[%c0_5, %c256] : memref<256x1024xf32, #tpu.memory_space<vmem>>, vector<256x256xf32>
    %cst_6 = arith.constant dense<0.000000e+00> : vector<2x256xf32>
    %5 = tpu.matmul %1, %4, %cst_6 {dimension_numbers = #tpu.dot_dimension_numbers<[1], [0], [0], [1], [0, 0, 1, 1], [], []>} : vector<2x256xf32>, vector<256x256xf32>, vector<2x256xf32> -> vector<2x256xf32>
    %6 = arith.maximumf %3, %5 : vector<2x256xf32>
    %c0_7 = arith.constant 0 : index
    %c512 = arith.constant 512 : index
    %7 = vector.load %arg2[%c0_7, %c512] : memref<256x1024xf32, #tpu.memory_space<vmem>>, vector<256x256xf32>
    %cst_8 = arith.constant dense<0.000000e+00> : vector<2x256xf32>
    %8 = tpu.matmul %1, %7, %cst_8 {dimension_numbers = #tpu.dot_dimension_numbers<[1], [0], [0], [1], [0, 0, 1, 1], [], []>} : vector<2x256xf32>, vector<256x256xf32>, vector<2x256xf32> -> vector<2x256xf32>
    %9 = arith.maximumf %6, %8 : vector<2x256xf32>
    %c0_9 = arith.constant 0 : index
    %c768 = arith.constant 768 : index
    %10 = vector.load %arg2[%c0_9, %c768] : memref<256x1024xf32, #tpu.memory_space<vmem>>, vector<256x256xf32>
    %cst_10 = arith.constant dense<0.000000e+00> : vector<2x256xf32>
    %11 = tpu.matmul %1, %10, %cst_10 {dimension_numbers = #tpu.dot_dimension_numbers<[1], [0], [0], [1], [0, 0, 1, 1], [], []>} : vector<2x256xf32>, vector<256x256xf32>, vector<2x256xf32> -> vector<2x256xf32>
    %12 = arith.maximumf %9, %11 : vector<2x256xf32>
    %13 = vector.extract_strided_slice %0 {offsets = [0, 0], sizes = [1, 256], strides = [1, 1]} : vector<8x256xf32> to vector<1x256xf32>
    %14 = vector.broadcast %13 : vector<1x256xf32> to vector<2x256xf32>
    %15 = arith.addf %12, %14 : vector<2x256xf32>
    %cst_11 = arith.constant 0.000000e+00 : f32
    %16 = vector.broadcast %cst_11 : f32 to vector<2x256xf32>
    %17 = arith.maximumf %15, %16 : vector<2x256xf32>
    %c0_12 = arith.constant 0 : index
    %c0_13 = arith.constant 0 : index
    %18 = vector.load %arg3[%c0_12, %c0_13] : memref<256x512xf32, #tpu.memory_space<vmem>>, vector<256x128xf32>
    %cst_14 = arith.constant dense<0.000000e+00> : vector<2x128xf32>
    %19 = tpu.matmul %17, %18, %cst_14 {dimension_numbers = #tpu.dot_dimension_numbers<[1], [0], [0], [1], [0, 0, 1, 1], [], []>} : vector<2x256xf32>, vector<256x128xf32>, vector<2x128xf32> -> vector<2x128xf32>
    %c0_15 = arith.constant 0 : index
    %c128 = arith.constant 128 : index
    %20 = vector.load %arg3[%c0_15, %c128] : memref<256x512xf32, #tpu.memory_space<vmem>>, vector<256x128xf32>
    %cst_16 = arith.constant dense<0.000000e+00> : vector<2x128xf32>
    %21 = tpu.matmul %17, %20, %cst_16 {dimension_numbers = #tpu.dot_dimension_numbers<[1], [0], [0], [1], [0, 0, 1, 1], [], []>} : vector<2x256xf32>, vector<256x128xf32>, vector<2x128xf32> -> vector<2x128xf32>
    %22 = arith.maximumf %19, %21 : vector<2x128xf32>
    %c0_17 = arith.constant 0 : index
    %c256_18 = arith.constant 256 : index
    %23 = vector.load %arg3[%c0_17, %c256_18] : memref<256x512xf32, #tpu.memory_space<vmem>>, vector<256x128xf32>
    %cst_19 = arith.constant dense<0.000000e+00> : vector<2x128xf32>
    %24 = tpu.matmul %17, %23, %cst_19 {dimension_numbers = #tpu.dot_dimension_numbers<[1], [0], [0], [1], [0, 0, 1, 1], [], []>} : vector<2x256xf32>, vector<256x128xf32>, vector<2x128xf32> -> vector<2x128xf32>
    %25 = arith.maximumf %22, %24 : vector<2x128xf32>
    %c0_20 = arith.constant 0 : index
    %c384 = arith.constant 384 : index
    %26 = vector.load %arg3[%c0_20, %c384] : memref<256x512xf32, #tpu.memory_space<vmem>>, vector<256x128xf32>
    %cst_21 = arith.constant dense<0.000000e+00> : vector<2x128xf32>
    %27 = tpu.matmul %17, %26, %cst_21 {dimension_numbers = #tpu.dot_dimension_numbers<[1], [0], [0], [1], [0, 0, 1, 1], [], []>} : vector<2x256xf32>, vector<256x128xf32>, vector<2x128xf32> -> vector<2x128xf32>
    %28 = arith.maximumf %25, %27 : vector<2x128xf32>
    %29 = vector.extract_strided_slice %0 {offsets = [1, 0], sizes = [1, 128], strides = [1, 1]} : vector<8x256xf32> to vector<1x128xf32>
    %30 = vector.broadcast %29 : vector<1x128xf32> to vector<2x128xf32>
    %31 = arith.addf %28, %30 : vector<2x128xf32>
    %cst_22 = arith.constant 0.000000e+00 : f32
    %32 = vector.broadcast %cst_22 : f32 to vector<2x128xf32>
    %33 = arith.maximumf %31, %32 : vector<2x128xf32>
    %c0_23 = arith.constant 0 : index
    %c0_24 = arith.constant 0 : index
    %34 = vector.load %arg4[%c0_23, %c0_24] : memref<128x128xf32, #tpu.memory_space<vmem>>, vector<128x128xf32>
    %cst_25 = arith.constant dense<0.000000e+00> : vector<2x128xf32>
    %35 = tpu.matmul %33, %34, %cst_25 {dimension_numbers = #tpu.dot_dimension_numbers<[1], [0], [0], [1], [0, 0, 1, 1], [], []>} : vector<2x128xf32>, vector<128x128xf32>, vector<2x128xf32> -> vector<2x128xf32>
    %36 = vector.extract_strided_slice %0 {offsets = [2, 0], sizes = [1, 128], strides = [1, 1]} : vector<8x256xf32> to vector<1x128xf32>
    %37 = vector.broadcast %36 : vector<1x128xf32> to vector<2x128xf32>
    %38 = arith.addf %35, %37 : vector<2x128xf32>
    %cst_26 = arith.constant 0.000000e+00 : f32
    %39 = vector.broadcast %cst_26 : f32 to vector<2x128xf32>
    %40 = arith.maximumf %38, %39 : vector<2x128xf32>
    %c0_27 = arith.constant 0 : index
    %c0_28 = arith.constant 0 : index
    %41 = vector.load %arg5[%c0_27, %c0_28] : memref<128x128xf32, #tpu.memory_space<vmem>>, vector<128x128xf32>
    %cst_29 = arith.constant dense<0.000000e+00> : vector<2x128xf32>
    %42 = tpu.matmul %40, %41, %cst_29 {dimension_numbers = #tpu.dot_dimension_numbers<[1], [0], [0], [1], [0, 0, 1, 1], [], []>} : vector<2x128xf32>, vector<128x128xf32>, vector<2x128xf32> -> vector<2x128xf32>
    %43 = vector.extract_strided_slice %0 {offsets = [3, 0], sizes = [1, 128], strides = [1, 1]} : vector<8x256xf32> to vector<1x128xf32>
    %44 = vector.broadcast %43 : vector<1x128xf32> to vector<2x128xf32>
    %45 = arith.addf %42, %44 : vector<2x128xf32>
    %cst_30 = arith.constant 0.000000e+00 : f32
    %46 = vector.broadcast %cst_30 : f32 to vector<2x128xf32>
    %47 = arith.maximumf %45, %46 : vector<2x128xf32>
    %c0_31 = arith.constant 0 : index
    %c0_32 = arith.constant 0 : index
    %48 = vector.load %arg6[%c0_31, %c0_32] : memref<128x128xf32, #tpu.memory_space<vmem>>, vector<128x128xf32>
    %cst_33 = arith.constant dense<0.000000e+00> : vector<2x128xf32>
    %49 = tpu.matmul %47, %48, %cst_33 {dimension_numbers = #tpu.dot_dimension_numbers<[1], [0], [0], [1], [0, 0, 1, 1], [], []>} : vector<2x128xf32>, vector<128x128xf32>, vector<2x128xf32> -> vector<2x128xf32>
    %50 = vector.extract_strided_slice %0 {offsets = [4, 0], sizes = [1, 128], strides = [1, 1]} : vector<8x256xf32> to vector<1x128xf32>
    %51 = vector.broadcast %50 : vector<1x128xf32> to vector<2x128xf32>
    %52 = arith.addf %49, %51 : vector<2x128xf32>
    %cst_34 = arith.constant 0.000000e+00 : f32
    %53 = vector.broadcast %cst_34 : f32 to vector<2x128xf32>
    %54 = arith.maximumf %52, %53 : vector<2x128xf32>
    %c0_35 = arith.constant 0 : index
    %c0_36 = arith.constant 0 : index
    %55 = vector.load %arg8[%c0_35, %c0_36] : memref<2x128xf32, #tpu.memory_space<vmem>>, vector<2x128xf32>
    tpu.vector_store %arg8[%c0_35, %c0_36], %54 {strides = array<i32>} : memref<2x128xf32, #tpu.memory_space<vmem>>, vector<2x128xf32>,
    return
  }
  func.func @transform_0(%arg0: i32) -> (i32, i32) {
    %c0_i32 = arith.constant 0 : i32
    %c0_i32_0 = arith.constant 0 : i32
    return %arg0, %c0_i32 : i32, i32
  }
  func.func @transform_1(%arg0: i32) -> (i32, i32) {
    %c0_i32 = arith.constant 0 : i32
    %c0_i32_0 = arith.constant 0 : i32
    %c0_i32_1 = arith.constant 0 : i32
    return %c0_i32, %c0_i32_0 : i32, i32
  }
  func.func @transform_2(%arg0: i32) -> (i32, i32) {
    %c0_i32 = arith.constant 0 : i32
    %c0_i32_0 = arith.constant 0 : i32
    %c0_i32_1 = arith.constant 0 : i32
    return %c0_i32, %c0_i32_0 : i32, i32
  }
  func.func @transform_3(%arg0: i32) -> (i32, i32) {
    %c0_i32 = arith.constant 0 : i32
    %c0_i32_0 = arith.constant 0 : i32
    %c0_i32_1 = arith.constant 0 : i32
    return %c0_i32, %c0_i32_0 : i32, i32
  }
  func.func @transform_4(%arg0: i32) -> (i32, i32) {
    %c0_i32 = arith.constant 0 : i32
    %c0_i32_0 = arith.constant 0 : i32
    %c0_i32_1 = arith.constant 0 : i32
    return %c0_i32, %c0_i32_0 : i32, i32
  }
  func.func @transform_5(%arg0: i32) -> (i32, i32) {
    %c0_i32 = arith.constant 0 : i32
    %c0_i32_0 = arith.constant 0 : i32
    %c0_i32_1 = arith.constant 0 : i32
    return %c0_i32, %c0_i32_0 : i32, i32
  }
  func.func @transform_6(%arg0: i32) -> (i32, i32) {
    %c0_i32 = arith.constant 0 : i32
    %c0_i32_0 = arith.constant 0 : i32
    %c0_i32_1 = arith.constant 0 : i32
    return %c0_i32, %c0_i32_0 : i32, i32
  }
  func.func @transform_7(%arg0: i32) -> (i32, i32) {
    %c0_i32 = arith.constant 0 : i32
    %c0_i32_0 = arith.constant 0 : i32
    return %arg0, %c0_i32 : i32, i32
  }
}

</mosaic_0001>

<bundles_post_ra>
// kernel: tpu_custom_call.1
= control target key start
LH: loop header
LB: loop body
LE: loop exit
PB: predicated region body
PF: predicated region fallthrough
CT: control target
= control target key end

     0   :  { %12 = vsyncpa [#allocation3], 0  ;;  %s2551_s0 = inlined_call_operand.hbm [shape: f32[2,256], index: 0, kind: input, shape index: {}]   ;;  %s2552_s1 = inlined_call_operand.hbm [shape: f32[256,1024], index: 1, kind: input, shape index: {}]   ;;  %s2553_s2 = inlined_call_operand.hbm [shape: f32[256,512], index: 2, kind: input, shape index: {}]   ;;  %s2554_s3 = inlined_call_operand.hbm [shape: f32[128,128], index: 3, kind: input, shape index: {}]   ;;  %s2555_s4 = inlined_call_operand.hbm [shape: f32[128,128], index: 4, kind: input, shape index: {}]   ;;  %s2556_s5 = inlined_call_operand.hbm [shape: f32[128,128], index: 5, kind: input, shape index: {}]   ;;  %s2557_s6 = inlined_call_operand.vmem [shape: f32[8,256], index: 6, kind: input, shape index: {}]   ;;  %s2558_s7 = inlined_call_operand.hbm [shape: f32[2,128], index: 7, kind: output, shape index: {}]  }
   0x1   :  { %13 = vsyncpa [#allocation6], 0 }
   0x2   :  { %14 = vsyncpa [#allocation9], 0 }
   0x3   :  { %15 = vsyncpa [#allocation12], 0 }
   0x4   :  { %16 = vsyncpa [#allocation4], 0  ;;  %s2321_s24 = smov [#allocation5]   ;;  %s2157_s28 = scalar_lea.hbm %s2552_s1, 32768 }
   0x5   :  { %s32_s25 = sshll.u32 %s2321_s24, 4  ;;  %p2158_p0 = scmp.ne.s32.totalorder %s2552_s1, %s2157_s28  ;;  %s33_s25 = int_to_ptr.vmem [resolvable:$true] %s32_s25 }
   0x6   :  { %p2161_p1 = scmp.lt.u32.totalorder %s2157_s28, %s2552_s1 }
   0x8   :  { %p2163_p2 = pnand %p2161_p1, %p2158_p0 }
   0xa   :  { %2166 = shalt.err (!%p2163_p2)
}
   0xb   :  { %s2167_s10 = scalar_lea.vmem %s33_s25, 32768  ;;  %p2172_p4 = scmp.lt.s32.totalorder %s33_s25, %s33_s25 }
   0xc   :  { %p2168_p3 = scmp.ne.s32.totalorder %s33_s25, %s2167_s10  ;;  %p2173_p5 = scmp.lt.s32.totalorder %s2167_s10, %s2167_s10 }
   0xe   :  { %p2174_p6 = por %p2173_p5, %p2172_p4 }
  0x10   :  { %p2175_p7 = pnand %p2174_p6, %p2168_p3 }
  0x12   :  { %2178 = shalt.err (!%p2175_p7)
}
  0x13   :  { %s2322_s11 = smov 1024   ;;  %s2323_s12 = smov 64  }
  0x14   :  { %38 = dma.hbm_to_vmem [thread:$0]  %s2552_s1, 32768, %s33_s25, [#allocation6], %s2322_s11, %s2322_s11, %s2323_s12  }
  0x15   :  { %s2324_s15 = smov [#allocation8]   ;;  %s2179_s19 = scalar_lea.hbm %s2554_s3, 2048 }
  0x16   :  { %s56_s16 = sshll.u32 %s2324_s15, 4  ;;  %p2180_p8 = scmp.ne.s32.totalorder %s2554_s3, %s2179_s19  ;;  %s57_s16 = int_to_ptr.vmem [resolvable:$true] %s56_s16 }
  0x17   :  { %p2183_p9 = scmp.lt.u32.totalorder %s2179_s19, %s2554_s3 }
  0x19   :  { %p2185_p10 = pnand %p2183_p9, %p2180_p8 }
  0x1b   :  { %2188 = shalt.err (!%p2185_p10)
}
  0x1c   :  { %s2189_s24 = scalar_lea.vmem %s57_s16, 2048  ;;  %p2194_p12 = scmp.lt.s32.totalorder %s57_s16, %s57_s16 }
  0x1d   :  { %p2190_p11 = scmp.ne.s32.totalorder %s57_s16, %s2189_s24  ;;  %p2195_p13 = scmp.lt.s32.totalorder %s2189_s24, %s2189_s24 }
  0x1f   :  { %p2196_p0 = por %p2195_p13, %p2194_p12 }
  0x21   :  { %p2197_p1 = pnand %p2196_p0, %p2190_p11 }
  0x23   :  { %2200 = shalt.err (!%p2197_p1)
}
  0x24   :  { %s2325_s1 = smov 128   ;;  %s2326_s25 = smov 8  }
  0x25   :  { %62 = dma.hbm_to_vmem [thread:$0]  %s2554_s3, 2048, %s57_s16, [#allocation9], %s2325_s1, %s2325_s1, %s2326_s25  }
  0x26   :  { %s2327_s28 = smov [#allocation2]   ;;  %s2328_s30 = smov [#allocation7]  }
  0x27   :  { %s23_s29 = sshll.u32 %s2327_s28, 4  ;;  %s44_s8 = sshll.u32 %s2328_s30, 4  ;;  %s24_s29 = int_to_ptr.vmem [resolvable:$true] %s23_s29  ;;  %s2404_s8 = int_to_ptr.vmem [resolvable:$true] %s44_s8 }
  0x28   :  { %s2201_s11 = scalar_lea.hbm %s2551_s0, 64 }
  0x29   :  { %p2202_p2 = scmp.ne.s32.totalorder %s2551_s0, %s2201_s11  ;;  %p2205_p3 = scmp.lt.u32.totalorder %s2201_s11, %s2551_s0 }
  0x2b   :  { %p2207_p4 = pnand %p2205_p3, %p2202_p2 }
  0x2d   :  { %2210 = shalt.err (!%p2207_p4)
}
  0x2e   :  { %s2211_s3 = scalar_lea.vmem %s24_s29, 64  ;;  %p2216_p6 = scmp.lt.s32.totalorder %s24_s29, %s24_s29 }
  0x2f   :  { %p2212_p5 = scmp.ne.s32.totalorder %s24_s29, %s2211_s3  ;;  %p2217_p7 = scmp.lt.s32.totalorder %s2211_s3, %s2211_s3 }
  0x31   :  { %p2218_p8 = por %p2217_p7, %p2216_p6 }
  0x33   :  { %p2219_p9 = pnand %p2218_p8, %p2212_p5 }
  0x35   :  { %2222 = shalt.err (!%p2219_p9)
}
  0x36   :  { %26 = dma.hbm_to_vmem [thread:$0]  %s2551_s0, 64, %s24_s29, [#allocation3]  }
  0x37   :  { %s2223_s20 = scalar_lea.hbm %s2553_s2, 16384 }
  0x38   :  { %p2224_p10 = scmp.ne.s32.totalorder %s2553_s2, %s2223_s20  ;;  %p2227_p11 = scmp.lt.u32.totalorder %s2223_s20, %s2553_s2 }
  0x3a   :  { %p2229_p12 = pnand %p2227_p11, %p2224_p10 }
  0x3c   :  { %2232 = shalt.err (!%p2229_p12)
}
  0x3d   :  { %s2233_s26 = scalar_lea.vmem %s2404_s8, 16384  ;;  %p2238_p0 = scmp.lt.s32.totalorder %s2404_s8, %s2404_s8 }
  0x3e   :  { %p2234_p13 = scmp.ne.s32.totalorder %s2404_s8, %s2233_s26  ;;  %p2239_p1 = scmp.lt.s32.totalorder %s2233_s26, %s2233_s26 }
  0x40   :  { %p2240_p2 = por %p2239_p1, %p2238_p0 }
  0x42   :  { %p2241_p3 = pnand %p2240_p2, %p2234_p13 }
  0x44   :  { %2244 = shalt.err (!%p2241_p3)
}
  0x45   :  { %s2329_s0 = smov 512   ;;  %s2330_s27 = smov 32  }
  0x46   :  { %50 = dma.hbm_to_vmem [thread:$0]  %s2553_s2, 16384, %s2404_s8, [#allocation6], %s2329_s0, %s2329_s0, %s2330_s27  }
  0x47   :  { %s2331_s30 = smov [#allocation10]   ;;  %s2332_s10 = smov [#allocation11]  }
  0x48   :  { %s68_s9 = sshll.u32 %s2331_s30, 4  ;;  %s80_s11 = sshll.u32 %s2332_s10, 4  ;;  %s69_s9 = int_to_ptr.vmem [resolvable:$true] %s68_s9  ;;  %s2435_s11 = int_to_ptr.vmem [resolvable:$true] %s80_s11 }
  0x49   :  { %s2245_s14 = scalar_lea.hbm %s2555_s4, 2048 }
  0x4a   :  { %p2246_p4 = scmp.ne.s32.totalorder %s2555_s4, %s2245_s14  ;;  %p2249_p5 = scmp.lt.u32.totalorder %s2245_s14, %s2555_s4 }
  0x4c   :  { %p2251_p6 = pnand %p2249_p5, %p2246_p4 }
  0x4e   :  { %2254 = shalt.err (!%p2251_p6)
}
  0x4f   :  { %s2255_s2 = scalar_lea.vmem %s69_s9, 2048  ;;  %p2260_p8 = scmp.lt.s32.totalorder %s69_s9, %s69_s9 }
  0x50   :  { %p2256_p7 = scmp.ne.s32.totalorder %s69_s9, %s2255_s2  ;;  %p2261_p9 = scmp.lt.s32.totalorder %s2255_s2, %s2255_s2 }
  0x52   :  { %p2262_p10 = por %p2261_p9, %p2260_p8 }
  0x54   :  { %p2263_p11 = pnand %p2262_p10, %p2256_p7 }
  0x56   :  { %2266 = shalt.err (!%p2263_p11)
}
  0x57   :  { %74 = dma.hbm_to_vmem [thread:$0]  %s2555_s4, 2048, %s69_s9, [#allocation9], %s2325_s1, %s2325_s1, %s2326_s25  }
  0x58   :  { %s2267_s21 = scalar_lea.hbm %s2556_s5, 2048 }
  0x59   :  { %p2268_p12 = scmp.ne.s32.totalorder %s2556_s5, %s2267_s21  ;;  %p2271_p13 = scmp.lt.u32.totalorder %s2267_s21, %s2556_s5 }
  0x5b   :  { %p2273_p0 = pnand %p2271_p13, %p2268_p12 }
  0x5d   :  { %2276 = shalt.err (!%p2273_p0)
}
  0x5e   :  { %s2277_s0 = scalar_lea.vmem %s2435_s11, 2048  ;;  %p2282_p2 = scmp.lt.s32.totalorder %s2435_s11, %s2435_s11 }
  0x5f   :  { %p2278_p1 = scmp.ne.s32.totalorder %s2435_s11, %s2277_s0  ;;  %p2283_p3 = scmp.lt.s32.totalorder %s2277_s0, %s2277_s0 }
  0x61   :  { %p2284_p4 = por %p2283_p3, %p2282_p2 }
  0x63   :  { %p2285_p5 = pnand %p2284_p4, %p2278_p1 }
  0x65   :  { %2288 = shalt.err (!%p2285_p5)
}
  0x66   :  { %86 = dma.hbm_to_vmem [thread:$0]  %s2556_s5, 2048, %s2435_s11, [#allocation12], %s2325_s1, %s2325_s1, %s2326_s25  }
  0x67   :  { %2311 = dma.done.wait [#allocation3], 64  }
  0x68   :  { %2312 = vsyncadd [#allocation3], 4294967232 }
  0x69   :  { %2313 = dma.done.wait [#allocation6], 49152  }
  0x6a   :  { %2314 = vsyncadd [#allocation6], 4294918144 }
  0x6b   :  { %2315 = dma.done.wait [#allocation9], 4096  }
  0x6c   :  { %2316 = vsyncadd [#allocation9], 4294963200 }
  0x6d   :  { %2317 = dma.done.wait [#allocation12], 2048  }
  0x6e   :  { %2318 = vsyncadd [#allocation12], 4294965248  ;;  %v111_v0 = vld [vmem:[#allocation5 + $0x8] sm:$0xff]  ;;  %v257_v2 = vld [vmem:[#allocation5 + $0x18] sm:$0xff]  ;;  %vm2334_vm0 = vmmov 0  }
  0x6f   :  { %v113_v1 = vld [vmem:[#allocation5 + $0x48] sm:$0xff]  ;;  %v259_v4 = vld [vmem:[#allocation5 + $0x58] sm:$0xff]  ;;  %v110_v5 = vld [vmem:[#allocation5] sm:$0xff] }
  0x70   :  { %v1685_v3 = vpack.c.bf16 %v113_v1, %v111_v0  ;;  %v112_v6 = vld [vmem:[#allocation5 + $0x40] sm:$0xff]  ;;  %v1749_v7 = vpack.c.bf16 %v259_v4, %v257_v2  ;;  %v256_v9 = vld [vmem:[#allocation5 + $0x10] sm:$0xff]  ;;  %v115_v11 = vld [vmem:[#allocation5 + $0x88] sm:$0xff] }
  0x71   :  { %v1687_v8 = vpack.c.bf16 %v112_v6, %v110_v5  ;;  %v258_v10 = vld [vmem:[#allocation5 + $0x50] sm:$0xff]  ;;  %v117_v13 = vld [vmem:[#allocation5 + $0xc8] sm:$0xff]  ;;  %v261_v14 = vld [vmem:[#allocation5 + $0x98] sm:$0xff] }
  0x72   :  { %1686 = vmatprep.subr.bf16.mxu0 %v1685_v3  ;;  %v1751_v12 = vpack.c.bf16 %v258_v10, %v256_v9  ;;  %v263_v15 = vld [vmem:[#allocation5 + $0xd8] sm:$0xff]  ;;  %1750 = vmatprep.subr.bf16.mxu1 %v1749_v7  ;;  %v1689_v16 = vpack.c.bf16 %v117_v13, %v115_v11  ;;  %v114_v18 = vld [vmem:[#allocation5 + $0x80] sm:$0xff]  ;;  %v260_v20 = vld [vmem:[#allocation5 + $0x90] sm:$0xff] }
  0x73   :  { %1688 = vmatpush1.bf16.msra.mxu0 %v1687_v8  ;;  %v1753_v17 = vpack.c.bf16 %v263_v15, %v261_v14  ;;  %v116_v19 = vld [vmem:[#allocation5 + $0xc0] sm:$0xff]  ;;  %v262_v22 = vld [vmem:[#allocation5 + $0xd0] sm:$0xff]  ;;  %v119_v23 = vld [vmem:[#allocation5 + $0x108] sm:$0xff] }
  0x74   :  { %1752 = vmatpush1.bf16.msra.mxu1 %v1751_v12  ;;  %v1691_v21 = vpack.c.bf16 %v116_v19, %v114_v18  ;;  %v121_v24 = vld [vmem:[#allocation5 + $0x148] sm:$0xff]  ;;  %1690 = vmatprep.subr.bf16.mxu0 %v1689_v16  ;;  %v1755_v25 = vpack.c.bf16 %v262_v22, %v260_v20  ;;  %v265_v27 = vld [vmem:[#allocation5 + $0x118] sm:$0xff]  ;;  %v118_v29 = vld [vmem:[#allocation5 + $0x100] sm:$0xff] }
  0x75   :  { %1754 = vmatprep.subr.bf16.mxu1 %v1753_v17  ;;  %v1693_v26 = vpack.c.bf16 %v121_v24, %v119_v23  ;;  %v267_v28 = vld [vmem:[#allocation5 + $0x158] sm:$0xff]  ;;  %v120_v31 = vld [vmem:[#allocation5 + $0x140] sm:$0xff]  ;;  %v264_v32 = vld [vmem:[#allocation5 + $0x110] sm:$0xff] }
  0x76   :  { %v1757_v30 = vpack.c.bf16 %v267_v28, %v265_v27  ;;  %v266_v33 = vld [vmem:[#allocation5 + $0x150] sm:$0xff]  ;;  %v1695_v34 = vpack.c.bf16 %v120_v31, %v118_v29  ;;  %v123_v35 = vld [vmem:[#allocation5 + $0x188] sm:$0xff]  ;;  %v269_v37 = vld [vmem:[#allocation5 + $0x198] sm:$0xff] }
  0x77   :  { %1692 = vmatpush1.bf16.msra.mxu0 %v1691_v21  ;;  %v125_v36 = vld [vmem:[#allocation5 + $0x1c8] sm:$0xff]  ;;  %v1759_v38 = vpack.c.bf16 %v266_v33, %v264_v32  ;;  %v271_v40 = vld [vmem:[#allocation5 + $0x1d8] sm:$0xff]  ;;  %v122_v41 = vld [vmem:[#allocation5 + $0x180] sm:$0xff] }
  0x78   :  { %1756 = vmatpush1.bf16.msra.mxu1 %v1755_v25  ;;  %1694 = vmatprep.subr.bf16.mxu0 %v1693_v26  ;;  %v1697_v39 = vpack.c.bf16 %v125_v36, %v123_v35  ;;  %v124_v42 = vld [vmem:[#allocation5 + $0x1c0] sm:$0xff]  ;;  %v1761_v43 = vpack.c.bf16 %v271_v40, %v269_v37  ;;  %v268_v44 = vld [vmem:[#allocation5 + $0x190] sm:$0xff]  ;;  %v127_v46 = vld [vmem:[#allocation5 + $0x208] sm:$0xff] }
  0x79   :  { %1758 = vmatprep.subr.bf16.mxu1 %v1757_v30  ;;  %v270_v45 = vld [vmem:[#allocation5 + $0x1d0] sm:$0xff]  ;;  %v129_v47 = vld [vmem:[#allocation5 + $0x248] sm:$0xff]  ;;  %v273_v48 = vld [vmem:[#allocation5 + $0x218] sm:$0xff]  ;;  %v1699_v50 = vpack.c.bf16 %v124_v42, %v122_v41 }
  0x7a   :  { %v275_v49 = vld [vmem:[#allocation5 + $0x258] sm:$0xff]  ;;  %v1763_v51 = vpack.c.bf16 %v270_v45, %v268_v44  ;;  %v1701_v52 = vpack.c.bf16 %v129_v47, %v127_v46  ;;  %v126_v53 = vld [vmem:[#allocation5 + $0x200] sm:$0xff]  ;;  %v272_v55 = vld [vmem:[#allocation5 + $0x210] sm:$0xff] }
  0x7b   :  { %1696 = vmatpush1.bf16.msra.mxu0 %v1695_v34  ;;  %v128_v54 = vld [vmem:[#allocation5 + $0x240] sm:$0xff]  ;;  %v1765_v56 = vpack.c.bf16 %v275_v49, %v273_v48  ;;  %v274_v57 = vld [vmem:[#allocation5 + $0x250] sm:$0xff]  ;;  %v131_v58 = vld [vmem:[#allocation5 + $0x288] sm:$0xff] }
  0x7c   :  { %1760 = vmatpush1.bf16.msra.mxu1 %v1759_v38  ;;  %1698 = vmatprep.subr.bf16.mxu0 %v1697_v39  ;;  %v133_v59 = vld [vmem:[#allocation5 + $0x2c8] sm:$0xff]  ;;  %v277_v60 = vld [vmem:[#allocation5 + $0x298] sm:$0xff]  ;;  %v1703_v62 = vpack.c.bf16 %v128_v54, %v126_v53  ;;  %v1767_v63 = vpack.c.bf16 %v274_v57, %v272_v55  ;;  %v130_v1 = vld [vmem:[#allocation5 + $0x280] sm:$0xff] }
  0x7d   :  { %1762 = vmatprep.subr.bf16.mxu1 %v1761_v43  ;;  %v279_v61 = vld [vmem:[#allocation5 + $0x2d8] sm:$0xff]  ;;  %v1705_v0 = vpack.c.bf16 %v133_v59, %v131_v58  ;;  %v132_v2 = vld [vmem:[#allocation5 + $0x2c0] sm:$0xff]  ;;  %v276_v3 = vld [vmem:[#allocation5 + $0x290] sm:$0xff] }
  0x7e   :  { %v1769_v4 = vpack.c.bf16 %v279_v61, %v277_v60  ;;  %v278_v5 = vld [vmem:[#allocation5 + $0x2d0] sm:$0xff]  ;;  %v135_v6 = vld [vmem:[#allocation5 + $0x308] sm:$0xff]  ;;  %v281_v8 = vld [vmem:[#allocation5 + $0x318] sm:$0xff]  ;;  %v1707_v10 = vpack.c.bf16 %v132_v2, %v130_v1 }
  0x7f   :  { %1700 = vmatpush1.bf16.msra.mxu0 %v1699_v50  ;;  %v137_v7 = vld [vmem:[#allocation5 + $0x348] sm:$0xff]  ;;  %v283_v9 = vld [vmem:[#allocation5 + $0x358] sm:$0xff]  ;;  %v1771_v11 = vpack.c.bf16 %v278_v5, %v276_v3  ;;  %v134_v13 = vld [vmem:[#allocation5 + $0x300] sm:$0xff] }
  0x80   :  { %1764 = vmatpush1.bf16.msra.mxu1 %v1763_v51  ;;  %1702 = vmatprep.subr.bf16.mxu0 %v1701_v52  ;;  %v1709_v12 = vpack.c.bf16 %v137_v7, %v135_v6  ;;  %v136_v14 = vld [vmem:[#allocation5 + $0x340] sm:$0xff]  ;;  %v280_v15 = vld [vmem:[#allocation5 + $0x310] sm:$0xff]  ;;  %v1773_v16 = vpack.c.bf16 %v283_v9, %v281_v8  ;;  %v139_v18 = vld [vmem:[#allocation5 + $0x388] sm:$0xff] }
  0x81   :  { %1766 = vmatprep.subr.bf16.mxu1 %v1765_v56  ;;  %v282_v17 = vld [vmem:[#allocation5 + $0x350] sm:$0xff]  ;;  %v141_v19 = vld [vmem:[#allocation5 + $0x3c8] sm:$0xff]  ;;  %v285_v20 = vld [vmem:[#allocation5 + $0x398] sm:$0xff]  ;;  %v1711_v22 = vpack.c.bf16 %v136_v14, %v134_v13 }
  0x82   :  { %v287_v21 = vld [vmem:[#allocation5 + $0x3d8] sm:$0xff]  ;;  %v1775_v23 = vpack.c.bf16 %v282_v17, %v280_v15  ;;  %v1713_v24 = vpack.c.bf16 %v141_v19, %v139_v18  ;;  %v138_v25 = vld [vmem:[#allocation5 + $0x380] sm:$0xff]  ;;  %v284_v27 = vld [vmem:[#allocation5 + $0x390] sm:$0xff] }
  0x83   :  { %1704 = vmatpush1.bf16.msra.mxu0 %v1703_v62  ;;  %v140_v26 = vld [vmem:[#allocation5 + $0x3c0] sm:$0xff]  ;;  %v1777_v28 = vpack.c.bf16 %v287_v21, %v285_v20  ;;  %v286_v29 = vld [vmem:[#allocation5 + $0x3d0] sm:$0xff]  ;;  %v143_v30 = vld [vmem:[#allocation5 + $0x408] sm:$0xff] }
  0x84   :  { %1768 = vmatpush1.bf16.msra.mxu1 %v1767_v63  ;;  %1706 = vmatprep.subr.bf16.mxu0 %v1705_v0  ;;  %v145_v31 = vld [vmem:[#allocation5 + $0x448] sm:$0xff]  ;;  %v289_v32 = vld [vmem:[#allocation5 + $0x418] sm:$0xff]  ;;  %v1715_v34 = vpack.c.bf16 %v140_v26, %v138_v25  ;;  %v1779_v35 = vpack.c.bf16 %v286_v29, %v284_v27  ;;  %v142_v37 = vld [vmem:[#allocation5 + $0x400] sm:$0xff] }
  0x85   :  { %1770 = vmatprep.subr.bf16.mxu1 %v1769_v4  ;;  %v291_v33 = vld [vmem:[#allocation5 + $0x458] sm:$0xff]  ;;  %v1717_v36 = vpack.c.bf16 %v145_v31, %v143_v30  ;;  %v144_v38 = vld [vmem:[#allocation5 + $0x440] sm:$0xff]  ;;  %v288_v39 = vld [vmem:[#allocation5 + $0x410] sm:$0xff] }
  0x86   :  { %v1781_v40 = vpack.c.bf16 %v291_v33, %v289_v32  ;;  %v290_v41 = vld [vmem:[#allocation5 + $0x450] sm:$0xff]  ;;  %v147_v42 = vld [vmem:[#allocation5 + $0x488] sm:$0xff]  ;;  %v293_v44 = vld [vmem:[#allocation5 + $0x498] sm:$0xff]  ;;  %v1719_v46 = vpack.c.bf16 %v144_v38, %v142_v37 }
  0x87   :  { %1708 = vmatpush1.bf16.msra.mxu0 %v1707_v10  ;;  %v149_v43 = vld [vmem:[#allocation5 + $0x4c8] sm:$0xff]  ;;  %v295_v45 = vld [vmem:[#allocation5 + $0x4d8] sm:$0xff]  ;;  %v1783_v47 = vpack.c.bf16 %v290_v41, %v288_v39  ;;  %v146_v49 = vld [vmem:[#allocation5 + $0x480] sm:$0xff] }
  0x88   :  { %1772 = vmatpush1.bf16.msra.mxu1 %v1771_v11  ;;  %1710 = vmatprep.subr.bf16.mxu0 %v1709_v12  ;;  %v1721_v48 = vpack.c.bf16 %v149_v43, %v147_v42  ;;  %v148_v50 = vld [vmem:[#allocation5 + $0x4c0] sm:$0xff]  ;;  %v292_v51 = vld [vmem:[#allocation5 + $0x490] sm:$0xff]  ;;  %v1785_v52 = vpack.c.bf16 %v295_v45, %v293_v44  ;;  %v151_v54 = vld [vmem:[#allocation5 + $0x508] sm:$0xff] }
  0x89   :  { %1774 = vmatprep.subr.bf16.mxu1 %v1773_v16  ;;  %v294_v53 = vld [vmem:[#allocation5 + $0x4d0] sm:$0xff]  ;;  %v153_v55 = vld [vmem:[#allocation5 + $0x548] sm:$0xff]  ;;  %v297_v56 = vld [vmem:[#allocation5 + $0x518] sm:$0xff]  ;;  %v1723_v58 = vpack.c.bf16 %v148_v50, %v146_v49 }
  0x8a   :  { %v299_v57 = vld [vmem:[#allocation5 + $0x558] sm:$0xff]  ;;  %v1787_v59 = vpack.c.bf16 %v294_v53, %v292_v51  ;;  %v1725_v60 = vpack.c.bf16 %v153_v55, %v151_v54  ;;  %v150_v61 = vld [vmem:[#allocation5 + $0x500] sm:$0xff]  ;;  %v296_v63 = vld [vmem:[#allocation5 + $0x510] sm:$0xff] }
  0x8b   :  { %1712 = vmatpush1.bf16.msra.mxu0 %v1711_v22  ;;  %v152_v62 = vld [vmem:[#allocation5 + $0x540] sm:$0xff]  ;;  %v1789_v0 = vpack.c.bf16 %v299_v57, %v297_v56  ;;  %v298_v1 = vld [vmem:[#allocation5 + $0x550] sm:$0xff]  ;;  %v155_v2 = vld [vmem:[#allocation5 + $0x588] sm:$0xff] }
  0x8c   :  { %1776 = vmatpush1.bf16.msra.mxu1 %v1775_v23  ;;  %1714 = vmatprep.subr.bf16.mxu0 %v1713_v24  ;;  %v157_v3 = vld [vmem:[#allocation5 + $0x5c8] sm:$0xff]  ;;  %v301_v4 = vld [vmem:[#allocation5 + $0x598] sm:$0xff]  ;;  %v1727_v6 = vpack.c.bf16 %v152_v62, %v150_v61  ;;  %v154_v7 = vld [vmem:[#allocation5 + $0x580] sm:$0xff]  ;;  %v1791_v8 = vpack.c.bf16 %v298_v1, %v296_v63 }
  0x8d   :  { %1778 = vmatprep.subr.bf16.mxu1 %v1777_v28  ;;  %v303_v5 = vld [vmem:[#allocation5 + $0x5d8] sm:$0xff]  ;;  %v1729_v9 = vpack.c.bf16 %v157_v3, %v155_v2  ;;  %v156_v10 = vld [vmem:[#allocation5 + $0x5c0] sm:$0xff]  ;;  %v300_v11 = vld [vmem:[#allocation5 + $0x590] sm:$0xff] }
  0x8e   :  { %v302_v12 = vld [vmem:[#allocation5 + $0x5d0] sm:$0xff]  ;;  %v1793_v13 = vpack.c.bf16 %v303_v5, %v301_v4  ;;  %v159_v14 = vld [vmem:[#allocation5 + $0x608] sm:$0xff]  ;;  %v2472_v16 = vld.sshfl [vmem:[#allocation2] sm:$0x33 pattern:$0x76325410]  ;;  %v1731_v20 = vpack.c.bf16 %v156_v10, %v154_v7 }
  0x8f   :  { %1716 = vmatpush1.bf16.msra.mxu0 %v1715_v34  ;;  %v161_v15 = vld [vmem:[#allocation5 + $0x648] sm:$0xff]  ;;  %v305_v17 = vld [vmem:[#allocation5 + $0x618] sm:$0xff]  ;;  %v2476_v19 = vcombine.high %v2472_v16, %v2472_v16  ;;  %v1795_v21 = vpack.c.bf16 %v302_v12, %v300_v11  ;;  %v158_v23 = vld [vmem:[#allocation5 + $0x600] sm:$0xff] }
  0x90   :  { %1780 = vmatpush1.bf16.msra.mxu1 %v1779_v35  ;;  %1718 = vmatprep.subr.bf16.mxu0 %v1717_v36  ;;  %v307_v18 = vld [vmem:[#allocation5 + $0x658] sm:$0xff]  ;;  %v1733_v22 = vpack.c.bf16 %v161_v15, %v159_v14  ;;  %v160_v24 = vld [vmem:[#allocation5 + $0x640] sm:$0xff]  ;;  %v304_v25 = vld [vmem:[#allocation5 + $0x610] sm:$0xff] }
  0x91   :  { %1782 = vmatprep.subr.bf16.mxu1 %v1781_v40  ;;  %v1797_v26 = vpack.c.bf16 %v307_v18, %v305_v17  ;;  %v306_v27 = vld [vmem:[#allocation5 + $0x650] sm:$0xff]  ;;  %v163_v28 = vld [vmem:[#allocation5 + $0x688] sm:$0xff]  ;;  %249 = vmatprep.mubr.f32.mxu0 %v2476_v19  ;;  %v309_v30 = vld [vmem:[#allocation5 + $0x698] sm:$0xff]  ;;  %v1735_v32 = vpack.c.bf16 %v160_v24, %v158_v23 }
  0x92   :  { %v165_v29 = vld [vmem:[#allocation5 + $0x6c8] sm:$0xff]  ;;  %v311_v31 = vld [vmem:[#allocation5 + $0x6d8] sm:$0xff]  ;;  %384 = vmatprep.mubr.f32.mxu1 %v2476_v19  ;;  %v1799_v33 = vpack.c.bf16 %v306_v27, %v304_v25  ;;  %v162_v35 = vld [vmem:[#allocation5 + $0x680] sm:$0xff] }
  0x93   :  { %1720 = vmatpush1.bf16.msra.mxu0 %v1719_v46  ;;  %v1737_v34 = vpack.c.bf16 %v165_v29, %v163_v28  ;;  %v164_v36 = vld [vmem:[#allocation5 + $0x6c0] sm:$0xff]  ;;  %v308_v37 = vld [vmem:[#allocation5 + $0x690] sm:$0xff]  ;;  %v1801_v38 = vpack.c.bf16 %v311_v31, %v309_v30  ;;  %v167_v40 = vld [vmem:[#allocation5 + $0x708] sm:$0xff] }
  0x94   :  { %1784 = vmatpush1.bf16.msra.mxu1 %v1783_v47  ;;  %1722 = vmatprep.subr.bf16.mxu0 %v1721_v48  ;;  %v310_v39 = vld [vmem:[#allocation5 + $0x6d0] sm:$0xff]  ;;  %v169_v41 = vld [vmem:[#allocation5 + $0x748] sm:$0xff]  ;;  %v313_v42 = vld [vmem:[#allocation5 + $0x718] sm:$0xff]  ;;  %v1739_v44 = vpack.c.bf16 %v164_v36, %v162_v35 }
  0x95   :  { %1786 = vmatprep.subr.bf16.mxu1 %v1785_v52  ;;  %v315_v43 = vld [vmem:[#allocation5 + $0x758] sm:$0xff]  ;;  %v1803_v45 = vpack.c.bf16 %v310_v39, %v308_v37  ;;  %v1741_v46 = vpack.c.bf16 %v169_v41, %v167_v40  ;;  %v166_v47 = vld [vmem:[#allocation5 + $0x700] sm:$0xff]  ;;  %v312_v49 = vld [vmem:[#allocation5 + $0x710] sm:$0xff] }
  0x96   :  { %v168_v48 = vld [vmem:[#allocation5 + $0x740] sm:$0xff]  ;;  %v1805_v50 = vpack.c.bf16 %v315_v43, %v313_v42  ;;  %v314_v51 = vld [vmem:[#allocation5 + $0x750] sm:$0xff]  ;;  %v171_v52 = vld [vmem:[#allocation5 + $0x788] sm:$0xff] }
  0x97   :  { %1724 = vmatpush1.bf16.msra.mxu0 %v1723_v58  ;;  %v173_v53 = vld [vmem:[#allocation5 + $0x7c8] sm:$0xff]  ;;  %v317_v54 = vld [vmem:[#allocation5 + $0x798] sm:$0xff]  ;;  %v1743_v56 = vpack.c.bf16 %v168_v48, %v166_v47  ;;  %v1807_v57 = vpack.c.bf16 %v314_v51, %v312_v49  ;;  %v316_v61 = vld [vmem:[#allocation5 + $0x790] sm:$0xff] }
  0x98   :  { %1788 = vmatpush1.bf16.msra.mxu1 %v1787_v59  ;;  %1726 = vmatprep.subr.bf16.mxu0 %v1725_v60  ;;  %v319_v55 = vld [vmem:[#allocation5 + $0x7d8] sm:$0xff]  ;;  %v1745_v58 = vpack.c.bf16 %v173_v53, %v171_v52  ;;  %v170_v59 = vld [vmem:[#allocation5 + $0x780] sm:$0xff]  ;;  %v318_v63 = vld [vmem:[#allocation5 + $0x7d0] sm:$0xff] }
  0x99   :  { %1790 = vmatprep.subr.bf16.mxu1 %v1789_v0  ;;  %v172_v60 = vld [vmem:[#allocation5 + $0x7c0] sm:$0xff]  ;;  %v1809_v62 = vpack.c.bf16 %v319_v55, %v317_v54  ;;  %v394_v0 = vld [vmem:[#allocation5 + $0x28] sm:$0xff]  ;;  %v531_v2 = vld [vmem:[#allocation5 + $0x38] sm:$0xff]  ;;  %v1811_v5 = vpack.c.bf16 %v318_v63, %v316_v61 }
  0x9a   :  { %v396_v1 = vld [vmem:[#allocation5 + $0x68] sm:$0xff]  ;;  %v533_v3 = vld [vmem:[#allocation5 + $0x78] sm:$0xff]  ;;  %v1747_v4 = vpack.c.bf16 %v172_v60, %v170_v59  ;;  %v393_v7 = vld [vmem:[#allocation5 + $0x20] sm:$0xff] }
  0x9b   :  { %1728 = vmatpush1.bf16.msra.mxu0 %v1727_v6  ;;  %v1813_v6 = vpack.c.bf16 %v396_v1, %v394_v0  ;;  %v1877_v10 = vpack.c.bf16 %v533_v3, %v531_v2  ;;  %v532_v11 = vld [vmem:[#allocation5 + $0x70] sm:$0xff]  ;;  %v398_v12 = vld [vmem:[#allocation5 + $0xa8] sm:$0xff]  ;;  %v535_v14 = vld [vmem:[#allocation5 + $0xb8] sm:$0xff] }
  0x9c   :  { %1792 = vmatpush1.bf16.msra.mxu1 %v1791_v8  ;;  %1730 = vmatprep.subr.bf16.mxu0 %v1729_v9  ;;  %v395_v8 = vld [vmem:[#allocation5 + $0x60] sm:$0xff]  ;;  %v530_v9 = vld [vmem:[#allocation5 + $0x30] sm:$0xff]  ;;  %v537_v15 = vld [vmem:[#allocation5 + $0xf8] sm:$0xff] }
  0x9d   :  { %1794 = vmatprep.subr.bf16.mxu1 %v1793_v13  ;;  %v400_v13 = vld [vmem:[#allocation5 + $0xe8] sm:$0xff]  ;;  %v1815_v17 = vpack.c.bf16 %v395_v8, %v393_v7  ;;  %v1879_v18 = vpack.c.bf16 %v532_v11, %v530_v9  ;;  %v534_v23 = vld [vmem:[#allocation5 + $0xb0] sm:$0xff]  ;;  %v1881_v24 = vpack.c.bf16 %v537_v15, %v535_v14  ;;  %v539_v28 = vld [vmem:[#allocation5 + $0x138] sm:$0xff] }
  0x9e   :  { %v536_v25 = vld [vmem:[#allocation5 + $0xf0] sm:$0xff]  ;;  %v404_v27 = vld [vmem:[#allocation5 + $0x168] sm:$0xff]  ;;  %v541_v29 = vld [vmem:[#allocation5 + $0x178] sm:$0xff] }
  0x9f   :  { %1732 = vmatpush1.bf16.msra.mxu0 %v1731_v20  ;;  %v1817_v20 = vpack.c.bf16 %v400_v13, %v398_v12  ;;  %v1883_v31 = vpack.c.bf16 %v536_v25, %v534_v23  ;;  %v538_v35 = vld [vmem:[#allocation5 + $0x130] sm:$0xff]  ;;  %v1885_v36 = vpack.c.bf16 %v541_v29, %v539_v28  ;;  %v408_v39 = vld [vmem:[#allocation5 + $0x1e8] sm:$0xff]  ;;  %v543_v40 = vld [vmem:[#allocation5 + $0x1b8] sm:$0xff] }
  0xa0   :  { %1796 = vmatpush1.bf16.msra.mxu1 %v1795_v21  ;;  %1734 = vmatprep.subr.bf16.mxu0 %v1733_v22  ;;  %v397_v21 = vld [vmem:[#allocation5 + $0xa0] sm:$0xff]  ;;  %v540_v37 = vld [vmem:[#allocation5 + $0x170] sm:$0xff]  ;;  %v545_v41 = vld [vmem:[#allocation5 + $0x1f8] sm:$0xff] }
  0xa1   :  { %1798 = vmatprep.subr.bf16.mxu1 %v1797_v26  ;;  %v399_v22 = vld [vmem:[#allocation5 + $0xe0] sm:$0xff]  ;;  %v402_v26 = vld [vmem:[#allocation5 + $0x128] sm:$0xff]  ;;  %v1887_v43 = vpack.c.bf16 %v540_v37, %v538_v35  ;;  %v542_v47 = vld [vmem:[#allocation5 + $0x1b0] sm:$0xff]  ;;  %v1889_v48 = vpack.c.bf16 %v545_v41, %v543_v40 }
  0xa2   :  { %v1819_v30 = vpack.c.bf16 %v399_v22, %v397_v21  ;;  %v544_v49 = vld [vmem:[#allocation5 + $0x1f0] sm:$0xff]  ;;  %v412_v51 = vld [vmem:[#allocation5 + $0x268] sm:$0xff]  ;;  %v547_v52 = vld [vmem:[#allocation5 + $0x238] sm:$0xff] }
  0xa3   :  { %1736 = vmatpush1.bf16.msra.mxu0 %v1735_v32  ;;  %v1821_v32 = vpack.c.bf16 %v404_v27, %v402_v26  ;;  %v549_v53 = vld [vmem:[#allocation5 + $0x278] sm:$0xff]  ;;  %v548_v60 = vld [vmem:[#allocation5 + $0x270] sm:$0xff]  ;;  %v414_v61 = vld [vmem:[#allocation5 + $0x2a8] sm:$0xff] }
  0xa4   :  { %1800 = vmatpush1.bf16.msra.mxu1 %v1799_v33  ;;  %1738 = vmatprep.subr.bf16.mxu0 %v1737_v34  ;;  %v401_v33 = vld [vmem:[#allocation5 + $0x120] sm:$0xff]  ;;  %v1893_v59 = vpack.c.bf16 %v549_v53, %v547_v52  ;;  %v551_v63 = vld [vmem:[#allocation5 + $0x2b8] sm:$0xff]  ;;  %v552_v8 = vld [vmem:[#allocation5 + $0x2f0] sm:$0xff] }
  0xa5   :  { %1802 = vmatprep.subr.bf16.mxu1 %v1801_v38  ;;  %v403_v34 = vld [vmem:[#allocation5 + $0x160] sm:$0xff]  ;;  %v406_v38 = vld [vmem:[#allocation5 + $0x1a8] sm:$0xff]  ;;  %v553_v0 = vld [vmem:[#allocation5 + $0x2f8] sm:$0xff] }
  0xa6   :  { %v1823_v42 = vpack.c.bf16 %v403_v34, %v401_v33  ;;  %v1897_v7 = vpack.c.bf16 %v553_v0, %v551_v63  ;;  %v418_v9 = vld [vmem:[#allocation5 + $0x328] sm:$0xff]  ;;  %v555_v11 = vld [vmem:[#allocation5 + $0x338] sm:$0xff]  ;;  %v556_v22 = vld [vmem:[#allocation5 + $0x370] sm:$0xff] }
  0xa7   :  { %1740 = vmatpush1.bf16.msra.mxu0 %v1739_v44  ;;  %v1825_v44 = vpack.c.bf16 %v408_v39, %v406_v38  ;;  %v557_v12 = vld [vmem:[#allocation5 + $0x378] sm:$0xff]  ;;  %v422_v23 = vld [vmem:[#allocation5 + $0x3a8] sm:$0xff]  ;;  %v560_v34 = vld [vmem:[#allocation5 + $0x3f0] sm:$0xff] }
  0xa8   :  { %1804 = vmatpush1.bf16.msra.mxu1 %v1803_v45  ;;  %1742 = vmatprep.subr.bf16.mxu0 %v1741_v46  ;;  %v405_v45 = vld [vmem:[#allocation5 + $0x1a0] sm:$0xff]  ;;  %v1901_v21 = vpack.c.bf16 %v557_v12, %v555_v11  ;;  %v559_v25 = vld [vmem:[#allocation5 + $0x3b8] sm:$0xff]  ;;  %v426_v35 = vld [vmem:[#allocation5 + $0x428] sm:$0xff] }
  0xa9   :  { %1806 = vmatprep.subr.bf16.mxu1 %v1805_v50  ;;  %v407_v46 = vld [vmem:[#allocation5 + $0x1e0] sm:$0xff]  ;;  %v410_v50 = vld [vmem:[#allocation5 + $0x228] sm:$0xff]  ;;  %v561_v26 = vld [vmem:[#allocation5 + $0x3f8] sm:$0xff] }
  0xaa   :  { %v1827_v54 = vpack.c.bf16 %v407_v46, %v405_v45  ;;  %v1829_v55 = vpack.c.bf16 %v412_v51, %v410_v50  ;;  %v1905_v33 = vpack.c.bf16 %v561_v26, %v559_v25  ;;  %v563_v37 = vld [vmem:[#allocation5 + $0x438] sm:$0xff]  ;;  %v564_v46 = vld [vmem:[#allocation5 + $0x470] sm:$0xff] }
  0xab   :  { %1744 = vmatpush1.bf16.msra.mxu0 %v1743_v56  ;;  %v409_v56 = vld [vmem:[#allocation5 + $0x220] sm:$0xff]  ;;  %v565_v38 = vld [vmem:[#allocation5 + $0x478] sm:$0xff] }
  0xac   :  { %1808 = vmatpush1.bf16.msra.mxu1 %v1807_v57  ;;  %1746 = vmatprep.subr.bf16.mxu0 %v1745_v58  ;;  %v411_v57 = vld [vmem:[#allocation5 + $0x260] sm:$0xff]  ;;  %v546_v58 = vld [vmem:[#allocation5 + $0x230] sm:$0xff]  ;;  %v1909_v45 = vpack.c.bf16 %v565_v38, %v563_v37  ;;  %v569_v50 = vld [vmem:[#allocation5 + $0x4f8] sm:$0xff] }
  0xad   :  { %1810 = vmatprep.subr.bf16.mxu1 %v1809_v62  ;;  %v416_v62 = vld [vmem:[#allocation5 + $0x2e8] sm:$0xff]  ;;  %v1831_v1 = vpack.c.bf16 %v411_v57, %v409_v56  ;;  %v1895_v2 = vpack.c.bf16 %v548_v60, %v546_v58  ;;  %v568_v57 = vld [vmem:[#allocation5 + $0x4f0] sm:$0xff]  ;;  %v571_v60 = vld [vmem:[#allocation5 + $0x538] sm:$0xff] }
  0xae   :  { %v1833_v3 = vpack.c.bf16 %v416_v62, %v414_v61  ;;  %v434_v58 = vld [vmem:[#allocation5 + $0x528] sm:$0xff]  ;;  %v573_v61 = vld [vmem:[#allocation5 + $0x578] sm:$0xff] }
  0xaf   :  { %1748 = vmatpush1.bf16.msra.mxu0 %v1747_v4  ;;  %v413_v4 = vld [vmem:[#allocation5 + $0x2a0] sm:$0xff] }
  0xb0   :  { %1812 = vmatpush1.bf16.msra.mxu1 %v1811_v5  ;;  %1814 = vmatprep.subr.bf16.mxu0 %v1813_v6  ;;  %v415_v5 = vld [vmem:[#allocation5 + $0x2e0] sm:$0xff]  ;;  %v550_v6 = vld [vmem:[#allocation5 + $0x2b0] sm:$0xff] }
  0xb1   :  { %1878 = vmatprep.subr.bf16.mxu1 %v1877_v10  ;;  %v420_v10 = vld [vmem:[#allocation5 + $0x368] sm:$0xff]  ;;  %v1835_v13 = vpack.c.bf16 %v415_v5, %v413_v4  ;;  %v1899_v14 = vpack.c.bf16 %v552_v8, %v550_v6  ;;  %v1917_v4 = vpack.c.bf16 %v573_v61, %v571_v60  ;;  %v572_v5 = vld [vmem:[#allocation5 + $0x570] sm:$0xff]  ;;  %v575_v8 = vld [vmem:[#allocation5 + $0x5b8] sm:$0xff] }
  0xb2   :  { %250 = vmatmul.mubr.f32.vlgmr.msra.gmra.mrb[0].mxu0 %v2472_v16  ;;  %v1837_v15 = vpack.c.bf16 %v420_v10, %v418_v9  ;;  %v438_v6 = vld [vmem:[#allocation5 + $0x5a8] sm:$0xff]  ;;  %v577_v9 = vld [vmem:[#allocation5 + $0x5f8] sm:$0xff] }
  0xb3   :  { %385 = vmatmul.mubr.f32.vlgmr.msra.gmra.mrb[0].mxu1 %v2472_v16  ;;  %1816 = vmatpush1.bf16.msra.mxu0 %v1815_v17  ;;  %v417_v17 = vld [vmem:[#allocation5 + $0x320] sm:$0xff] }
  0xb4   :  { %1880 = vmatpush1.bf16.msra.mxu1 %v1879_v18  ;;  %1818 = vmatprep.subr.bf16.mxu0 %v1817_v20  ;;  %v419_v18 = vld [vmem:[#allocation5 + $0x360] sm:$0xff]  ;;  %v554_v20 = vld [vmem:[#allocation5 + $0x330] sm:$0xff] }
  0xb5   :  { %1882 = vmatprep.subr.bf16.mxu1 %v1881_v24  ;;  %521 = vmatprep.mubr.f32.mxu0 %v2476_v19  ;;  %v424_v24 = vld [vmem:[#allocation5 + $0x3e8] sm:$0xff]  ;;  %v1839_v27 = vpack.c.bf16 %v419_v18, %v417_v17  ;;  %v1903_v28 = vpack.c.bf16 %v556_v22, %v554_v20  ;;  %v1921_v17 = vpack.c.bf16 %v577_v9, %v575_v8  ;;  %v576_v18 = vld [vmem:[#allocation5 + $0x5f0] sm:$0xff]  ;;  %v579_v22 = vld [vmem:[#allocation5 + $0x638] sm:$0xff] }
  0xb6   :  { %658 = vmatprep.mubr.f32.mxu1 %v2476_v19  ;;  %v1891_v19 = vpack.c.bf16 %v544_v49, %v542_v47  ;;  %v1841_v29 = vpack.c.bf16 %v424_v24, %v422_v23  ;;  %v430_v47 = vld [vmem:[#allocation5 + $0x4a8] sm:$0xff]  ;;  %v567_v49 = vld [vmem:[#allocation5 + $0x4b8] sm:$0xff] }
  0xb7   :  { %1820 = vmatpush1.bf16.msra.mxu0 %v1819_v30  ;;  %v421_v30 = vld [vmem:[#allocation5 + $0x3a0] sm:$0xff]  ;;  %v1913_v56 = vpack.c.bf16 %v569_v50, %v567_v49  ;;  %v442_v20 = vld [vmem:[#allocation5 + $0x628] sm:$0xff]  ;;  %v581_v23 = vld [vmem:[#allocation5 + $0x678] sm:$0xff] }
  0xb8   :  { %1884 = vmatpush1.bf16.msra.mxu1 %v1883_v31  ;;  %1822 = vmatprep.subr.bf16.mxu0 %v1821_v32  ;;  %v423_v31 = vld [vmem:[#allocation5 + $0x3e0] sm:$0xff]  ;;  %v558_v32 = vld [vmem:[#allocation5 + $0x3b0] sm:$0xff]  ;;  %v798_v9 = vld [vmem:[#allocation7 + $0x228] sm:$0xff] }
  0xb9   :  { %1886 = vmatprep.subr.bf16.mxu1 %v1885_v36  ;;  %v428_v36 = vld [vmem:[#allocation5 + $0x468] sm:$0xff]  ;;  %v1843_v39 = vpack.c.bf16 %v423_v31, %v421_v30  ;;  %v1907_v40 = vpack.c.bf16 %v560_v34, %v558_v32  ;;  %v1925_v30 = vpack.c.bf16 %v581_v23, %v579_v22  ;;  %v580_v31 = vld [vmem:[#allocation5 + $0x670] sm:$0xff]  ;;  %v583_v34 = vld [vmem:[#allocation5 + $0x6b8] sm:$0xff] }
  0xba   :  { %v1845_v41 = vpack.c.bf16 %v428_v36, %v426_v35  ;;  %v446_v32 = vld [vmem:[#allocation5 + $0x6a8] sm:$0xff]  ;;  %v585_v35 = vld [vmem:[#allocation5 + $0x6f8] sm:$0xff] }
  0xbb   :  { %1824 = vmatpush1.bf16.msra.mxu0 %v1823_v42  ;;  %v425_v42 = vld [vmem:[#allocation5 + $0x420] sm:$0xff]  ;;  %v800_v22 = vld [vmem:[#allocation7 + $0x268] sm:$0xff] }
  0xbc   :  { %1888 = vmatpush1.bf16.msra.mxu1 %v1887_v43  ;;  %1826 = vmatprep.subr.bf16.mxu0 %v1825_v44  ;;  %v427_v43 = vld [vmem:[#allocation5 + $0x460] sm:$0xff]  ;;  %v562_v44 = vld [vmem:[#allocation5 + $0x430] sm:$0xff] }
  0xbd   :  { %1890 = vmatprep.subr.bf16.mxu1 %v1889_v48  ;;  %v432_v48 = vld [vmem:[#allocation5 + $0x4e8] sm:$0xff]  ;;  %v1847_v51 = vpack.c.bf16 %v427_v43, %v425_v42  ;;  %v1911_v52 = vpack.c.bf16 %v564_v46, %v562_v44  ;;  %v1929_v42 = vpack.c.bf16 %v585_v35, %v583_v34  ;;  %v584_v43 = vld [vmem:[#allocation5 + $0x6f0] sm:$0xff]  ;;  %v587_v46 = vld [vmem:[#allocation5 + $0x738] sm:$0xff] }
  0xbe   :  { %v1849_v53 = vpack.c.bf16 %v432_v48, %v430_v47  ;;  %v450_v44 = vld [vmem:[#allocation5 + $0x728] sm:$0xff]  ;;  %v589_v47 = vld [vmem:[#allocation5 + $0x778] sm:$0xff]  ;;  %v683_v35 = vld [vmem:[#allocation7 + $0x80] sm:$0xff] }
  0xbf   :  { %1828 = vmatpush1.bf16.msra.mxu0 %v1827_v54  ;;  %v429_v54 = vld [vmem:[#allocation5 + $0x4a0] sm:$0xff]  ;;  %v802_v34 = vld [vmem:[#allocation7 + $0x2a8] sm:$0xff] }
  0xc0   :  { %1892 = vmatpush1.bf16.msra.mxu1 %v1891_v19  ;;  %1830 = vmatprep.subr.bf16.mxu0 %v1829_v55  ;;  %v431_v19 = vld [vmem:[#allocation5 + $0x4e0] sm:$0xff]  ;;  %v566_v55 = vld [vmem:[#allocation5 + $0x4b0] sm:$0xff] }
  0xc1   :  { %1894 = vmatprep.subr.bf16.mxu1 %v1893_v59  ;;  %v436_v59 = vld [vmem:[#allocation5 + $0x568] sm:$0xff]  ;;  %v1851_v62 = vpack.c.bf16 %v431_v19, %v429_v54  ;;  %v1915_v63 = vpack.c.bf16 %v568_v57, %v566_v55  ;;  %v1933_v54 = vpack.c.bf16 %v589_v47, %v587_v46  ;;  %v588_v19 = vld [vmem:[#allocation5 + $0x770] sm:$0xff]  ;;  %v591_v57 = vld [vmem:[#allocation5 + $0x7b8] sm:$0xff] }
  0xc2   :  { %v1853_v0 = vpack.c.bf16 %v436_v59, %v434_v58  ;;  %v454_v55 = vld [vmem:[#allocation5 + $0x7a8] sm:$0xff]  ;;  %v593_v58 = vld [vmem:[#allocation5 + $0x7f8] sm:$0xff]  ;;  %v685_v47 = vld [vmem:[#allocation7 + $0xc0] sm:$0xff] }
  0xc3   :  { %1832 = vmatpush1.bf16.msra.mxu0 %v1831_v1  ;;  %v433_v1 = vld [vmem:[#allocation5 + $0x520] sm:$0xff]  ;;  %v804_v46 = vld [vmem:[#allocation7 + $0x2e8] sm:$0xff] }
  0xc4   :  { %1896 = vmatpush1.bf16.msra.mxu1 %v1895_v2  ;;  %1834 = vmatprep.subr.bf16.mxu0 %v1833_v3  ;;  %v435_v2 = vld [vmem:[#allocation5 + $0x560] sm:$0xff]  ;;  %v570_v3 = vld [vmem:[#allocation5 + $0x530] sm:$0xff] }
  0xc5   :  { %1898 = vmatprep.subr.bf16.mxu1 %v1897_v7  ;;  %v440_v7 = vld [vmem:[#allocation5 + $0x5e8] sm:$0xff]  ;;  %v1855_v10 = vpack.c.bf16 %v435_v2, %v433_v1  ;;  %v1919_v11 = vpack.c.bf16 %v572_v5, %v570_v3  ;;  %v590_v1 = vld [vmem:[#allocation5 + $0x7b0] sm:$0xff]  ;;  %v695_v5 = vld [vmem:[#allocation7 + $0x200] sm:$0xff] }
  0xc6   :  { %v1857_v12 = vpack.c.bf16 %v440_v7, %v438_v6  ;;  %v592_v2 = vld [vmem:[#allocation5 + $0x7f0] sm:$0xff]  ;;  %v696_v6 = vld [vmem:[#allocation7 + $0x220] sm:$0xff]  ;;  %v797_v7 = vld [vmem:[#allocation7 + $0x208] sm:$0xff] }
  0xc7   :  { %1836 = vmatpush1.bf16.msra.mxu0 %v1835_v13  ;;  %v437_v13 = vld [vmem:[#allocation5 + $0x5a0] sm:$0xff]  ;;  %v1941_v8 = vpack.c.bf16 %v696_v6, %v695_v5 }
  0xc8   :  { %1900 = vmatpush1.bf16.msra.mxu1 %v1899_v14  ;;  %1838 = vmatprep.subr.bf16.mxu0 %v1837_v15  ;;  %v439_v14 = vld [vmem:[#allocation5 + $0x5e0] sm:$0xff]  ;;  %v574_v15 = vld [vmem:[#allocation5 + $0x5b0] sm:$0xff] }
  0xc9   :  { %1902 = vmatprep.subr.bf16.mxu1 %v1901_v21  ;;  %v444_v21 = vld [vmem:[#allocation5 + $0x668] sm:$0xff]  ;;  %v1859_v24 = vpack.c.bf16 %v439_v14, %v437_v13  ;;  %v1923_v25 = vpack.c.bf16 %v576_v18, %v574_v15  ;;  %v689_v6 = vld [vmem:[#allocation7 + $0x140] sm:$0xff] }
  0xca   :  { %v1861_v26 = vpack.c.bf16 %v444_v21, %v442_v20  ;;  %v781_v14 = vld [vmem:[#allocation7 + $0x8] sm:$0xff]  ;;  %v698_v20 = vld [vmem:[#allocation7 + $0x260] sm:$0xff] }
  0xcb   :  { %1840 = vmatpush1.bf16.msra.mxu0 %v1839_v27  ;;  %v441_v27 = vld [vmem:[#allocation5 + $0x620] sm:$0xff]  ;;  %v782_v15 = vld [vmem:[#allocation7 + $0x28] sm:$0xff] }
  0xcc   :  { %1904 = vmatpush1.bf16.msra.mxu1 %v1903_v28  ;;  %1842 = vmatprep.subr.bf16.mxu0 %v1841_v29  ;;  %v443_v28 = vld [vmem:[#allocation5 + $0x660] sm:$0xff]  ;;  %v578_v29 = vld [vmem:[#allocation5 + $0x630] sm:$0xff]  ;;  %v1975_v18 = vpack.c.bf16 %v782_v15, %v781_v14  ;;  %v799_v21 = vld [vmem:[#allocation7 + $0x248] sm:$0xff] }
  0xcd   :  { %1906 = vmatprep.subr.bf16.mxu1 %v1905_v33  ;;  %v448_v33 = vld [vmem:[#allocation5 + $0x6e8] sm:$0xff]  ;;  %v1863_v36 = vpack.c.bf16 %v443_v28, %v441_v27  ;;  %v1927_v37 = vpack.c.bf16 %v580_v31, %v578_v29  ;;  %v1977_v23 = vpack.c.bf16 %v800_v22, %v799_v21  ;;  %v699_v29 = vld [vmem:[#allocation7 + $0x280] sm:$0xff] }
  0xce   :  { %v1865_v38 = vpack.c.bf16 %v448_v33, %v446_v32  ;;  %v784_v28 = vld [vmem:[#allocation7 + $0x68] sm:$0xff]  ;;  %v708_v14 = vld [vmem:[#allocation7 + $0x3a0] sm:$0xff] }
  0xcf   :  { %1844 = vmatpush1.bf16.msra.mxu0 %v1843_v39  ;;  %v445_v39 = vld [vmem:[#allocation5 + $0x6a0] sm:$0xff]  ;;  %v801_v33 = vld [vmem:[#allocation7 + $0x288] sm:$0xff] }
  0xd0   :  { %1908 = vmatpush1.bf16.msra.mxu1 %v1907_v40  ;;  %1846 = vmatprep.subr.bf16.mxu0 %v1845_v41  ;;  %v447_v40 = vld [vmem:[#allocation5 + $0x6e0] sm:$0xff]  ;;  %v582_v41 = vld [vmem:[#allocation5 + $0x6b0] sm:$0xff]  ;;  %v809_v15 = vld [vmem:[#allocation7 + $0x388] sm:$0xff] }
  0xd1   :  { %1910 = vmatprep.subr.bf16.mxu1 %v1909_v45  ;;  %v452_v45 = vld [vmem:[#allocation5 + $0x768] sm:$0xff]  ;;  %v1867_v48 = vpack.c.bf16 %v447_v40, %v445_v39  ;;  %v1931_v49 = vpack.c.bf16 %v584_v43, %v582_v41  ;;  %v701_v41 = vld [vmem:[#allocation7 + $0x2c0] sm:$0xff] }
  0xd2   :  { %v1869_v50 = vpack.c.bf16 %v452_v45, %v450_v44  ;;  %v786_v39 = vld [vmem:[#allocation7 + $0xa8] sm:$0xff]  ;;  %v692_v21 = vld [vmem:[#allocation7 + $0x1a0] sm:$0xff] }
  0xd3   :  { %1848 = vmatpush1.bf16.msra.mxu0 %v1847_v51  ;;  %v449_v51 = vld [vmem:[#allocation5 + $0x720] sm:$0xff]  ;;  %v803_v43 = vld [vmem:[#allocation7 + $0x2c8] sm:$0xff] }
  0xd4   :  { %1912 = vmatpush1.bf16.msra.mxu1 %v1911_v52  ;;  %1850 = vmatprep.subr.bf16.mxu0 %v1849_v53  ;;  %v451_v52 = vld [vmem:[#allocation5 + $0x760] sm:$0xff]  ;;  %v586_v53 = vld [vmem:[#allocation5 + $0x730] sm:$0xff] }
  0xd5   :  { %1914 = vmatprep.subr.bf16.mxu1 %v1913_v56  ;;  %v456_v56 = vld [vmem:[#allocation5 + $0x7e8] sm:$0xff]  ;;  %v1871_v59 = vpack.c.bf16 %v451_v52, %v449_v51  ;;  %v1935_v60 = vpack.c.bf16 %v588_v19, %v586_v53  ;;  %v703_v52 = vld [vmem:[#allocation7 + $0x300] sm:$0xff] }
  0xd6   :  { %v1873_v61 = vpack.c.bf16 %v456_v56, %v454_v55  ;;  %v788_v51 = vld [vmem:[#allocation7 + $0xe8] sm:$0xff]  ;;  %v704_v53 = vld [vmem:[#allocation7 + $0x320] sm:$0xff] }
  0xd7   :  { %1852 = vmatpush1.bf16.msra.mxu0 %v1851_v62  ;;  %v453_v62 = vld [vmem:[#allocation5 + $0x7a0] sm:$0xff]  ;;  %v806_v19 = vld [vmem:[#allocation7 + $0x328] sm:$0xff] }
  0xd8   :  { %1916 = vmatpush1.bf16.msra.mxu1 %v1915_v63  ;;  %1854 = vmatprep.subr.bf16.mxu0 %v1853_v0  ;;  %v455_v63 = vld [vmem:[#allocation5 + $0x7e0] sm:$0xff]  ;;  %v1937_v0 = vpack.c.bf16 %v593_v58, %v591_v57  ;;  %v1957_v57 = vpack.c.bf16 %v704_v53, %v703_v52  ;;  %v2492_v53 = vld [vmem:[%s2557_s6] sm:$0xff] }
  0xd9   :  { %1918 = vmatprep.subr.bf16.mxu1 %v1917_v4  ;;  %v1875_v3 = vpack.c.bf16 %v455_v63, %v453_v62  ;;  %v1939_v4 = vpack.c.bf16 %v592_v2, %v590_v1  ;;  %v687_v58 = vld [vmem:[#allocation7 + $0x100] sm:$0xff]  ;;  %v790_v62 = vld [vmem:[#allocation7 + $0x128] sm:$0xff] }
  0xda   :  { %v705_v63 = vld [vmem:[#allocation7 + $0x340] sm:$0xff]  ;;  %v807_v1 = vld [vmem:[#allocation7 + $0x348] sm:$0xff] }
  0xdb   :  { %1856 = vmatpush1.bf16.msra.mxu0 %v1855_v10  ;;  %v679_v10 = vld [vmem:[#allocation7] sm:$0xff]  ;;  %v808_v2 = vld [vmem:[#allocation7 + $0x368] sm:$0xff] }
  0xdc   :  { %1920 = vmatpush1.bf16.msra.mxu1 %v1919_v11  ;;  %1858 = vmatprep.subr.bf16.mxu0 %v1857_v12  ;;  %v680_v11 = vld [vmem:[#allocation7 + $0x20] sm:$0xff]  ;;  %v1973_v12 = vpack.c.bf16 %v798_v9, %v797_v7  ;;  %v791_v9 = vld [vmem:[#allocation7 + $0x148] sm:$0xff] }
  0xdd   :  { %1922 = vmatprep.subr.bf16.mxu1 %v1921_v17  ;;  %v1943_v13 = vpack.c.bf16 %v680_v11, %v679_v10  ;;  %v697_v17 = vld [vmem:[#allocation7 + $0x240] sm:$0xff]  ;;  %v792_v10 = vld [vmem:[#allocation7 + $0x168] sm:$0xff] }
  0xde   :  { %v690_v7 = vld [vmem:[#allocation7 + $0x160] sm:$0xff] }
  0xdf   :  { %1860 = vmatpush1.bf16.msra.mxu0 %v1859_v24  ;;  %v681_v24 = vld [vmem:[#allocation7 + $0x40] sm:$0xff]  ;;  %v1963_v11 = vpack.c.bf16 %v690_v7, %v689_v6  ;;  %v902_v6 = vld [vmem:[#allocation7 + $0x250] sm:$0xff] }
  0xe0   :  { %1924 = vmatpush1.bf16.msra.mxu1 %v1923_v25  ;;  %1862 = vmatprep.subr.bf16.mxu0 %v1861_v26  ;;  %v682_v25 = vld [vmem:[#allocation7 + $0x60] sm:$0xff]  ;;  %v783_v26 = vld [vmem:[#allocation7 + $0x48] sm:$0xff]  ;;  %v903_v7 = vld [vmem:[#allocation7 + $0x270] sm:$0xff] }
  0xe1   :  { %1926 = vmatprep.subr.bf16.mxu1 %v1925_v30  ;;  %v1947_v27 = vpack.c.bf16 %v682_v25, %v681_v24  ;;  %v700_v30 = vld [vmem:[#allocation7 + $0x2a0] sm:$0xff]  ;;  %v1979_v31 = vpack.c.bf16 %v784_v28, %v783_v26  ;;  %v794_v24 = vld [vmem:[#allocation7 + $0x1a8] sm:$0xff] }
  0xe2   :  { %v1949_v32 = vpack.c.bf16 %v700_v30, %v699_v29  ;;  %v709_v26 = vld [vmem:[#allocation7 + $0x3c0] sm:$0xff]  ;;  %v811_v29 = vld [vmem:[#allocation7 + $0x3c8] sm:$0xff] }
  0xe3   :  { %1864 = vmatpush1.bf16.msra.mxu0 %v1863_v36  ;;  %v1981_v36 = vpack.c.bf16 %v802_v34, %v801_v33  ;;  %v812_v30 = vld [vmem:[#allocation7 + $0x3e8] sm:$0xff]  ;;  %v694_v33 = vld [vmem:[#allocation7 + $0x1e0] sm:$0xff] }
  0xe4   :  { %1928 = vmatpush1.bf16.msra.mxu1 %v1927_v37  ;;  %1866 = vmatprep.subr.bf16.mxu0 %v1865_v38  ;;  %v684_v37 = vld [vmem:[#allocation7 + $0xa0] sm:$0xff]  ;;  %v785_v38 = vld [vmem:[#allocation7 + $0x88] sm:$0xff] }
  0xe5   :  { %1930 = vmatprep.subr.bf16.mxu1 %v1929_v42  ;;  %v1951_v40 = vpack.c.bf16 %v684_v37, %v683_v35  ;;  %v702_v42 = vld [vmem:[#allocation7 + $0x2e0] sm:$0xff]  ;;  %v1983_v44 = vpack.c.bf16 %v786_v39, %v785_v38  ;;  %v795_v34 = vld [vmem:[#allocation7 + $0x1c8] sm:$0xff]  ;;  %v900_v38 = vld [vmem:[#allocation7 + $0x210] sm:$0xff] }
  0xe6   :  { %v1953_v45 = vpack.c.bf16 %v702_v42, %v701_v41  ;;  %v796_v35 = vld [vmem:[#allocation7 + $0x1e8] sm:$0xff]  ;;  %v901_v39 = vld [vmem:[#allocation7 + $0x230] sm:$0xff]  ;;  %v1004_v42 = vld [vmem:[#allocation7 + $0x238] sm:$0xff] }
  0xe7   :  { %1868 = vmatpush1.bf16.msra.mxu0 %v1867_v48  ;;  %v686_v48 = vld [vmem:[#allocation7 + $0xe0] sm:$0xff]  ;;  %v2003_v37 = vpack.c.bf16 %v796_v35, %v795_v34  ;;  %v2005_v41 = vpack.c.bf16 %v901_v39, %v900_v38  ;;  %v907_v34 = vld [vmem:[#allocation7 + $0x2f0] sm:$0xff]  ;;  %v1009_v35 = vld [vmem:[#allocation7 + $0x2d8] sm:$0xff] }
  0xe8   :  { %1932 = vmatpush1.bf16.msra.mxu1 %v1931_v49  ;;  %1870 = vmatprep.subr.bf16.mxu0 %v1869_v50  ;;  %v1985_v49 = vpack.c.bf16 %v804_v46, %v803_v43  ;;  %v787_v50 = vld [vmem:[#allocation7 + $0xc8] sm:$0xff]  ;;  %v1955_v55 = vpack.c.bf16 %v686_v48, %v685_v47  ;;  %v890_v39 = vld [vmem:[#allocation7 + $0xd0] sm:$0xff] }
  0xe9   :  { %1934 = vmatprep.subr.bf16.mxu1 %v1933_v54  ;;  %v805_v54 = vld [vmem:[#allocation7 + $0x308] sm:$0xff]  ;;  %v1987_v56 = vpack.c.bf16 %v788_v51, %v787_v50  ;;  %v667_v50 = vlaneseq }
  0xeb   :  { %1872 = vmatpush1.bf16.msra.mxu0 %v1871_v59  ;;  %v688_v59 = vld [vmem:[#allocation7 + $0x120] sm:$0xff]  ;;  %v2486_v51 = vshrl.u32 %v667_v50, 7 }
  0xec   :  { %1936 = vmatpush1.bf16.msra.mxu1 %v1935_v60  ;;  %1874 = vmatprep.subr.bf16.mxu0 %v1873_v61  ;;  %v789_v60 = vld [vmem:[#allocation7 + $0x108] sm:$0xff]  ;;  %v1989_v61 = vpack.c.bf16 %v806_v19, %v805_v54  ;;  %v108_v54 = vld [vmem:[%s2557_s6 + $0x8] sm:$0xff]  ;;  %s2336_s6 = smov [#allocation13]  }
  0xed   :  { %1938 = vmatprep.subr.bf16.mxu1 %v1937_v0  ;;  %v706_v0 = vld [vmem:[#allocation7 + $0x360] sm:$0xff]  ;;  %v669_v52 = vsub.s32 0, %v2486_v51  ;;  %s1376_s29 = sshll.u32 %s2336_s6, 4  ;;  %s1377_s29 = int_to_ptr.vmem [resolvable:$true] %s1376_s29 }
  0xee   :  { %v1961_v5 = vpack.c.bf16 %v706_v0, %v705_v63  ;;  %v884_v0 = vld [vmem:[#allocation7 + $0x10] sm:$0xff]  ;;  %s2289_s30 = scalar_lea.vmem %s1377_s29, 32  ;;  %p2294_p7 = scmp.lt.s32.totalorder %s1377_s29, %s1377_s29 }
  0xef   :  { %1876 = vmatpush1.bf16.msra.mxu0 %v1875_v3  ;;  %v1959_v3 = vpack.c.bf16 %v688_v59, %v687_v58  ;;  %v670_v58 = vrot.slane %v2492_v53, %v669_v52  ;;  %p2290_p6 = scmp.ne.s32.totalorder %s1377_s29, %s2289_s30  ;;  %p2295_p8 = scmp.lt.s32.totalorder %s2289_s30, %s2289_s30 }
  0xf0   :  { %1940 = vmatpush1.bf16.msra.mxu1 %v1939_v4  ;;  %1942 = vmatprep.subr.bf16.mxu0 %v1941_v8  ;;  %v1991_v4 = vpack.c.bf16 %v790_v62, %v789_v60  ;;  %v1993_v8 = vpack.c.bf16 %v808_v2, %v807_v1  ;;  %v885_v2 = vld [vmem:[#allocation7 + $0x30] sm:$0xff] }
  0xf1   :  { %1974 = vmatprep.subr.bf16.mxu1 %v1973_v12  ;;  %v1995_v12 = vpack.c.bf16 %v792_v10, %v791_v9  ;;  %v1006_v9 = vld [vmem:[#allocation7 + $0x278] sm:$0xff]  ;;  %p2296_p9 = por %p2295_p8, %p2294_p7 }
  0xf2   :  { %522 = vmatmul.mubr.f32.vlgmr.msra.gmra.mrb[2].mxu0 %v2472_v16 }
  0xf3   :  { %659 = vmatmul.mubr.f32.vlgmr.msra.gmra.mrb[2].mxu1 %v2472_v16  ;;  %1944 = vmatpush3.bf16.msra.mxu0 %v1943_v13  ;;  %v1945_v16 = vpack.c.bf16 %v698_v20, %v697_v17  ;;  %v707_v13 = vld [vmem:[#allocation7 + $0x380] sm:$0xff]  ;;  %p2297_p10 = pnand %p2296_p9, %p2290_p6 }
  0xf4   :  { %1976 = vmatpush3.bf16.msra.mxu1 %v1975_v18  ;;  %v1965_v17 = vpack.c.bf16 %v708_v14, %v707_v13  ;;  %v810_v18 = vld [vmem:[#allocation7 + $0x3a8] sm:$0xff]  ;;  %v691_v20 = vld [vmem:[#allocation7 + $0x180] sm:$0xff]  ;;  %v886_v13 = vld [vmem:[#allocation7 + $0x50] sm:$0xff] }
  0xf5   :  { %1946 = vmatprep.subr.bf16.mxu0 %v1945_v16  ;;  %1978 = vmatprep.subr.bf16.mxu1 %v1977_v23  ;;  %v1997_v22 = vpack.c.bf16 %v810_v18, %v809_v15  ;;  %v1967_v16 = vpack.c.bf16 %v692_v21, %v691_v20  ;;  %v793_v23 = vld [vmem:[#allocation7 + $0x188] sm:$0xff]  ;;  %v887_v14 = vld [vmem:[#allocation7 + $0x70] sm:$0xff]  ;;  %v990_v18 = vld [vmem:[#allocation7 + $0x78] sm:$0xff]  ;;  %v2009_v21 = vpack.c.bf16 %v903_v7, %v902_v6 }
  0xf6   :  { %v1999_v25 = vpack.c.bf16 %v794_v24, %v793_v23  ;;  %v904_v20 = vld [vmem:[#allocation7 + $0x290] sm:$0xff]  ;;  %v1007_v23 = vld [vmem:[#allocation7 + $0x298] sm:$0xff] }
  0xf7   :  { %1948 = vmatpush3.bf16.msra.mxu0 %v1947_v27  ;;  %v710_v27 = vld [vmem:[#allocation7 + $0x3e0] sm:$0xff]  ;;  %v1008_v24 = vld [vmem:[#allocation7 + $0x2b8] sm:$0xff]  ;;  %v912_v6 = vld [vmem:[#allocation7 + $0x390] sm:$0xff] }
  0xf8   :  { %1980 = vmatpush3.bf16.msra.mxu1 %v1979_v31  ;;  %1950 = vmatprep.subr.bf16.mxu0 %v1949_v32  ;;  %v1969_v28 = vpack.c.bf16 %v710_v27, %v709_v26  ;;  %v693_v31 = vld [vmem:[#allocation7 + $0x1c0] sm:$0xff]  ;;  %v2001_v32 = vpack.c.bf16 %v812_v30, %v811_v29  ;;  %v888_v27 = vld [vmem:[#allocation7 + $0x90] sm:$0xff]  ;;  %v2045_v30 = vpack.c.bf16 %v1008_v24, %v1007_v23  ;;  %v1018_v23 = vld [vmem:[#allocation7 + $0x3f8] sm:$0xff] }
  0xf9   :  { %1982 = vmatprep.subr.bf16.mxu1 %v1981_v36  ;;  %v1971_v36 = vpack.c.bf16 %v694_v33, %v693_v31  ;;  %v991_v31 = vld [vmem:[#allocation7 + $0x98] sm:$0xff]  ;;  %v906_v33 = vld [vmem:[#allocation7 + $0x2d0] sm:$0xff] }
  0xfa   :  { %v913_v7 = vld [vmem:[#allocation7 + $0x3b0] sm:$0xff] }
  0xfb   :  { %1952 = vmatpush3.bf16.msra.mxu0 %v1951_v40  ;;  %v1003_v40 = vld [vmem:[#allocation7 + $0x218] sm:$0xff] }
  0xfc   :  { %1984 = vmatpush3.bf16.msra.mxu1 %v1983_v44  ;;  %1954 = vmatprep.subr.bf16.mxu0 %v1953_v45  ;;  %v2037_v43 = vpack.c.bf16 %v1004_v42, %v1003_v40  ;;  %v891_v40 = vld [vmem:[#allocation7 + $0xf0] sm:$0xff] }
  0xfd   :  { %1986 = vmatprep.subr.bf16.mxu1 %v1985_v49 }
  0xff   :  { %1956 = vmatpush3.bf16.msra.mxu0 %v1955_v55 }
 0x100   :  { %1988 = vmatpush3.bf16.msra.mxu1 %v1987_v56  ;;  %1958 = vmatprep.subr.bf16.mxu0 %v1957_v57 }
 0x101   :  { %1990 = vmatprep.subr.bf16.mxu1 %v1989_v61  ;;  %v674_v61 = vrot.slane %v108_v54, %v669_v52  ;;  %v892_v52 = vld [vmem:[#allocation7 + $0x110] sm:$0xff] }
 0x102   :  { %v893_v54 = vld [vmem:[#allocation7 + $0x130] sm:$0xff] }
 0x103   :  { %1960 = vmatpush3.bf16.msra.mxu0 %v1959_v3  ;;  %v987_v3 = vld [vmem:[#allocation7 + $0x18] sm:$0xff] }
 0x104   :  { %1992 = vmatpush3.bf16.msra.mxu1 %v1991_v4  ;;  %1962 = vmatprep.subr.bf16.mxu0 %v1961_v5  ;;  %v988_v4 = vld [vmem:[#allocation7 + $0x38] sm:$0xff] }
 0x105   :  { %1994 = vmatprep.subr.bf16.mxu1 %v1993_v8  ;;  %v1005_v8 = vld [vmem:[#allocation7 + $0x258] sm:$0xff] }
 0x107   :  { %1964 = vmatpush3.bf16.msra.mxu0 %v1963_v11  ;;  %v2007_v11 = vpack.c.bf16 %v885_v2, %v884_v0  ;;  %v894_v0 = vld [vmem:[#allocation7 + $0x150] sm:$0xff] }
 0x108   :  { %1996 = vmatpush3.bf16.msra.mxu1 %v1995_v12  ;;  %1966 = vmatprep.subr.bf16.mxu0 %v1965_v17  ;;  %v2039_v12 = vpack.c.bf16 %v988_v4, %v987_v3  ;;  %v989_v17 = vld [vmem:[#allocation7 + $0x58] sm:$0xff] }
 0x109   :  { %1998 = vmatprep.subr.bf16.mxu1 %v1997_v22  ;;  %v2041_v22 = vpack.c.bf16 %v1006_v9, %v1005_v8  ;;  %v2043_v26 = vpack.c.bf16 %v990_v18, %v989_v17  ;;  %v997_v4 = vld [vmem:[#allocation7 + $0x158] sm:$0xff] }
 0x10a   :  { %v1015_v8 = vld [vmem:[#allocation7 + $0x398] sm:$0xff] }
 0x10b   :  { %1968 = vmatpush3.bf16.msra.mxu0 %v1967_v16  ;;  %v905_v16 = vld [vmem:[#allocation7 + $0x2b0] sm:$0xff]  ;;  %v1016_v9 = vld [vmem:[#allocation7 + $0x3b8] sm:$0xff] }
 0x10c   :  { %2000 = vmatpush3.bf16.msra.mxu1 %v1999_v25  ;;  %1970 = vmatprep.subr.bf16.mxu0 %v1969_v28  ;;  %v2011_v25 = vpack.c.bf16 %v887_v14, %v886_v13  ;;  %v889_v28 = vld [vmem:[#allocation7 + $0xb0] sm:$0xff]  ;;  %v2013_v29 = vpack.c.bf16 %v905_v16, %v904_v20  ;;  %v2029_v14 = vpack.c.bf16 %v913_v7, %v912_v6  ;;  %v999_v18 = vld [vmem:[#allocation7 + $0x198] sm:$0xff] }
 0x10d   :  { %2002 = vmatprep.subr.bf16.mxu1 %v2001_v32  ;;  %v992_v32 = vld [vmem:[#allocation7 + $0xb8] sm:$0xff]  ;;  %v897_v13 = vld [vmem:[#allocation7 + $0x1b0] sm:$0xff]  ;;  %v2061_v17 = vpack.c.bf16 %v1016_v9, %v1015_v8  ;;  %v1195_v8 = vld [vmem:[#allocation10 + $0x40] sm:$0xff] }
 0x10e   :  { %v2047_v38 = vpack.c.bf16 %v992_v32, %v991_v31  ;;  %v1000_v20 = vld [vmem:[#allocation7 + $0x1b8] sm:$0xff]  ;;  %v1196_v9 = vld [vmem:[#allocation10 + $0x48] sm:$0xff] }
 0x10f   :  { %1972 = vmatpush3.bf16.msra.mxu0 %v1971_v36  ;;  %v1010_v36 = vld [vmem:[#allocation7 + $0x2f8] sm:$0xff] }
 0x110   :  { %2004 = vmatpush3.bf16.msra.mxu1 %v2003_v37  ;;  %2006 = vmatprep.subr.bf16.mxu0 %v2005_v41  ;;  %v2015_v37 = vpack.c.bf16 %v889_v28, %v888_v27  ;;  %v2017_v41 = vpack.c.bf16 %v907_v34, %v906_v33  ;;  %v2049_v42 = vpack.c.bf16 %v1010_v36, %v1009_v35  ;;  %v1017_v16 = vld [vmem:[#allocation7 + $0x3d8] sm:$0xff]  ;;  %v1096_v34 = vld [vmem:[#allocation8] sm:$0xff]  ;;  %v1097_v35 = vld [vmem:[#allocation8 + $0x8] sm:$0xff] }
 0x111   :  { %2038 = vmatprep.subr.bf16.mxu1 %v2037_v43  ;;  %v993_v43 = vld [vmem:[#allocation7 + $0xd8] sm:$0xff]  ;;  %v2065_v28 = vpack.c.bf16 %v1018_v23, %v1017_v16  ;;  %v1098_v36 = vld [vmem:[#allocation8 + $0x10] sm:$0xff] }
 0x112   :  { %v1002_v31 = vld [vmem:[#allocation7 + $0x1f8] sm:$0xff] }
 0x113   :  { %v1194_v6 = vld [vmem:[#allocation10 + $0x38] sm:$0xff] }
 0x185   :  { %v251_v44 = vpop.f32.mrb[0].mxu0 }
 0x186   :  { %v386_v45 = vpop.f32.mrb[0].mxu1  ;;  %v253_v46 = vpop.f32.mrb[1].mxu0 }
 0x187   :  { %v391_v47 = vmax.f32 %v251_v44, %v386_v45  ;;  %v388_v48 = vpop.f32.mrb[1].mxu1  ;;  %v994_v44 = vld [vmem:[#allocation7 + $0xf8] sm:$0xff]  ;;  %v908_v45 = vld [vmem:[#allocation7 + $0x310] sm:$0xff] }
 0x188   :  { %v392_v49 = vmax.f32 %v253_v46, %v388_v48  ;;  %v909_v46 = vld [vmem:[#allocation7 + $0x330] sm:$0xff]  ;;  %v1012_v48 = vld [vmem:[#allocation7 + $0x338] sm:$0xff]  ;;  %v2051_v50 = vpack.c.bf16 %v994_v44, %v993_v43 }
 0x189   :  { %v1103_v44 = vld [vmem:[#allocation8 + $0x38] sm:$0xff] }
 0x1c5   :  { %v523_v19 = vpop.f32.mrb[2].mxu0 }
 0x1c6   :  { %v528_v55 = vmax.f32 %v391_v47, %v523_v19  ;;  %v525_v56 = vpop.f32.mrb[3].mxu0  ;;  %v660_v57 = vpop.f32.mrb[2].mxu1  ;;  %v1011_v47 = vld [vmem:[#allocation7 + $0x318] sm:$0xff]  ;;  %v2021_v19 = vpack.c.bf16 %v909_v46, %v908_v45  ;;  %v1104_v46 = vld [vmem:[#allocation8 + $0x40] sm:$0xff] }
 0x1c7   :  { %v529_v59 = vmax.f32 %v392_v49, %v525_v56  ;;  %v662_v60 = vpop.f32.mrb[3].mxu1  ;;  %v2019_v49 = vpack.c.bf16 %v891_v40, %v890_v39  ;;  %v995_v56 = vld [vmem:[#allocation7 + $0x118] sm:$0xff] }
 0x1c8   :  { %v665_v62 = vmax.f32 %v528_v55, %v660_v57  ;;  %v2053_v55 = vpack.c.bf16 %v1012_v48, %v1011_v47  ;;  %v996_v57 = vld [vmem:[#allocation7 + $0x138] sm:$0xff]  ;;  %v1105_v47 = vld [vmem:[#allocation8 + $0x48] sm:$0xff] }
 0x1c9   :  { %v666_v63 = vmax.f32 %v529_v59, %v662_v60  ;;  %v911_v59 = vld [vmem:[#allocation7 + $0x370] sm:$0xff]  ;;  %v1013_v60 = vld [vmem:[#allocation7 + $0x358] sm:$0xff]  ;;  %v2082_v48 = vpack.c.bf16 %v1105_v47, %v1104_v46  ;;  %v1282_v47 = vld [vmem:[#allocation11 + $0x20] sm:$0xff] }
 0x1ca   :  { %v675_v1 = vadd.f32 %v670_v58, %v665_v62  ;;  %v910_v58 = vld [vmem:[#allocation7 + $0x350] sm:$0xff]  ;;  %v2023_v62 = vpack.c.bf16 %v893_v54, %v892_v52  ;;  %v1099_v39 = vld [vmem:[#allocation8 + $0x18] sm:$0xff]  ;;  %v1108_v54 = vld [vmem:[#allocation8 + $0x60] sm:$0xff] }
 0x1cb   :  { %v676_v5 = vadd.f32 %v674_v61, %v666_v63  ;;  %v1014_v61 = vld [vmem:[#allocation7 + $0x378] sm:$0xff]  ;;  %v2055_v63 = vpack.c.bf16 %v996_v57, %v995_v56  ;;  %v2025_v2 = vpack.c.bf16 %v911_v59, %v910_v58  ;;  %v2073_v40 = vpack.c.bf16 %v1099_v39, %v1098_v36  ;;  %v1110_v56 = vld [vmem:[#allocation8 + $0x70] sm:$0xff] }
 0x1cc   :  { %v2498_v15 = vmax.f32 %v675_v1, 0.0  ;;  %v895_v1 = vld [vmem:[#allocation7 + $0x170] sm:$0xff]  ;;  %v2057_v3 = vpack.c.bf16 %v1014_v61, %v1013_v60  ;;  %v1111_v57 = vld [vmem:[#allocation8 + $0x78] sm:$0xff]  ;;  %v2335_v59 = vmov 0.0   ;;  %v1187_v60 = vld [vmem:[#allocation10] sm:$0xff] }
 0x1cd   :  { %v678_v10 = vmax.f32 %v676_v5, 0.0  ;;  %v998_v5 = vld [vmem:[#allocation7 + $0x178] sm:$0xff]  ;;  %v2091_v58 = vpack.c.bf16 %v1111_v57, %v1110_v56  ;;  %v1188_v61 = vld [vmem:[#allocation10 + $0x8] sm:$0xff]  ;;  %v1201_v39 = vld [vmem:[#allocation10 + $0x70] sm:$0xff] }
 0x1ce   :  { %v1288_v57 = vld [vmem:[#allocation11 + $0x50] sm:$0xff] }
 0x1cf   :  { %775 = vmatprep.mubr.f32.mxu0 %v678_v10  ;;  %877 = vmatprep.mubr.f32.mxu1 %v678_v10 }
 0x1d0   :  { %776 = vmatmul.mubr.f32.vlgmr.msra.gmra.mrb[4].mxu0 %v2498_v15  ;;  %878 = vmatmul.mubr.f32.vlgmr.msra.gmra.mrb[4].mxu1 %v2498_v15 }
 0x1d1   :  { %2008 = vmatpush3.bf16.msra.mxu0 %v2007_v11  ;;  %2040 = vmatpush3.bf16.msra.mxu1 %v2039_v12  ;;  %v2059_v11 = vpack.c.bf16 %v998_v5, %v997_v4  ;;  %v896_v12 = vld [vmem:[#allocation7 + $0x190] sm:$0xff] }
 0x1d2   :  { %980 = vmatprep.mubr.f32.mxu0 %v678_v10  ;;  %1083 = vmatprep.mubr.f32.mxu1 %v678_v10  ;;  %v2027_v10 = vpack.c.bf16 %v895_v1, %v894_v0  ;;  %v2031_v24 = vpack.c.bf16 %v897_v13, %v896_v12  ;;  %v1190_v0 = vld [vmem:[#allocation10 + $0x18] sm:$0xff]  ;;  %v1193_v5 = vld [vmem:[#allocation10 + $0x30] sm:$0xff] }
 0x1d3   :  { %2010 = vmatprep.subr.bf16.mxu0 %v2009_v21  ;;  %2042 = vmatprep.subr.bf16.mxu1 %v2041_v22  ;;  %v914_v21 = vld [vmem:[#allocation7 + $0x3d0] sm:$0xff]  ;;  %v2103_v7 = vpack.c.bf16 %v1194_v6, %v1193_v5  ;;  %v1198_v12 = vld [vmem:[#allocation10 + $0x58] sm:$0xff] }
 0x1d4   :  { %v915_v22 = vld [vmem:[#allocation7 + $0x3f0] sm:$0xff]  ;;  %v1293_v6 = vld [vmem:[#allocation11 + $0x78] sm:$0xff] }
 0x1d5   :  { %2012 = vmatpush3.bf16.msra.mxu0 %v2011_v25  ;;  %2044 = vmatpush3.bf16.msra.mxu1 %v2043_v26  ;;  %v2063_v25 = vpack.c.bf16 %v1000_v20, %v999_v18  ;;  %v898_v26 = vld [vmem:[#allocation7 + $0x1d0] sm:$0xff]  ;;  %v2033_v27 = vpack.c.bf16 %v915_v22, %v914_v21 }
 0x1d6   :  { %2014 = vmatprep.subr.bf16.mxu0 %v2013_v29  ;;  %2046 = vmatprep.subr.bf16.mxu1 %v2045_v30  ;;  %v899_v29 = vld [vmem:[#allocation7 + $0x1f0] sm:$0xff]  ;;  %v1001_v30 = vld [vmem:[#allocation7 + $0x1d8] sm:$0xff] }
 0x1d7   :  { %v2035_v32 = vpack.c.bf16 %v899_v29, %v898_v26  ;;  %v2067_v33 = vpack.c.bf16 %v1002_v31, %v1001_v30  ;;  %v1292_v5 = vld [vmem:[#allocation11 + $0x70] sm:$0xff] }
 0x1d9   :  { %2016 = vmatpush3.bf16.msra.mxu0 %v2015_v37  ;;  %2048 = vmatpush3.bf16.msra.mxu1 %v2047_v38  ;;  %v2333_v37 = vmov 0.0|0.0   ;;  %v2070_v38 = vpack.c.bf16 %v1097_v35, %v1096_v34 }
 0x1da   :  { %2018 = vmatprep.subr.bf16.mxu0 %v2017_v41  ;;  %2050 = vmatprep.subr.bf16.mxu1 %v2049_v42  ;;  %v1100_v41 = vld [vmem:[#allocation8 + $0x20] sm:$0xff]  ;;  %v1101_v42 = vld [vmem:[#allocation8 + $0x28] sm:$0xff] }
 0x1db   :  { %v2076_v43 = vpack.c.bf16 %v1101_v42, %v1100_v41  ;;  %v1278_v42 = vld [vmem:[#allocation11] sm:$0xff] }
 0x1dd   :  { %2020 = vmatpush3.bf16.msra.mxu0 %v2019_v49  ;;  %2052 = vmatpush3.bf16.msra.mxu1 %v2051_v50  ;;  %v1106_v49 = vld [vmem:[#allocation8 + $0x50] sm:$0xff]  ;;  %v1107_v50 = vld [vmem:[#allocation8 + $0x58] sm:$0xff] }
 0x1de   :  { %2022 = vmatprep.subr.bf16.mxu0 %v2021_v19  ;;  %2054 = vmatprep.subr.bf16.mxu1 %v2053_v55  ;;  %v2085_v52 = vpack.c.bf16 %v1107_v50, %v1106_v49  ;;  %v1109_v19 = vld [vmem:[#allocation8 + $0x68] sm:$0xff]  ;;  %v1284_v50 = vld [vmem:[#allocation11 + $0x30] sm:$0xff] }
 0x1df   :  { %v2088_v55 = vpack.c.bf16 %v1109_v19, %v1108_v54  ;;  %v1286_v19 = vld [vmem:[#allocation11 + $0x40] sm:$0xff] }
 0x1e1   :  { %2024 = vmatpush3.bf16.msra.mxu0 %v2023_v62  ;;  %2056 = vmatpush3.bf16.msra.mxu1 %v2055_v63  ;;  %v1189_v62 = vld [vmem:[#allocation10 + $0x10] sm:$0xff]  ;;  %v2094_v63 = vpack.c.bf16 %v1188_v61, %v1187_v60  ;;  %v1290_v60 = vld [vmem:[#allocation11 + $0x60] sm:$0xff]  ;;  %v1291_v61 = vld [vmem:[#allocation11 + $0x68] sm:$0xff] }
 0x1e2   :  { %2026 = vmatprep.subr.bf16.mxu0 %v2025_v2  ;;  %2058 = vmatprep.subr.bf16.mxu1 %v2057_v3  ;;  %v2097_v1 = vpack.c.bf16 %v1190_v0, %v1189_v62  ;;  %v1191_v2 = vld [vmem:[#allocation10 + $0x20] sm:$0xff]  ;;  %v1192_v3 = vld [vmem:[#allocation10 + $0x28] sm:$0xff]  ;;  %v2136_v62 = vpack.c.bf16 %v1291_v61, %v1290_v60 }
 0x1e3   :  { %v2100_v4 = vpack.c.bf16 %v1192_v3, %v1191_v2 }
 0x1e5   :  { %2028 = vmatpush3.bf16.msra.mxu0 %v2027_v10  ;;  %2060 = vmatpush3.bf16.msra.mxu1 %v2059_v11  ;;  %v2106_v10 = vpack.c.bf16 %v1196_v9, %v1195_v8  ;;  %v1197_v11 = vld [vmem:[#allocation10 + $0x50] sm:$0xff]  ;;  %v1205_v8 = vsub.s32 3, %v2486_v51 }
 0x1e6   :  { %2030 = vmatprep.subr.bf16.mxu0 %v2029_v14  ;;  %2062 = vmatprep.subr.bf16.mxu1 %v2061_v17  ;;  %v2109_v13 = vpack.c.bf16 %v1198_v12, %v1197_v11  ;;  %v1199_v14 = vld [vmem:[#allocation10 + $0x60] sm:$0xff]  ;;  %v1200_v17 = vld [vmem:[#allocation10 + $0x68] sm:$0xff] }
 0x1e7   :  { %v2112_v18 = vpack.c.bf16 %v1200_v17, %v1199_v14  ;;  %v1206_v9 = vrot.slane %v2492_v53, %v1205_v8 }
 0x1e9   :  { %2032 = vmatpush3.bf16.msra.mxu0 %v2031_v24  ;;  %2064 = vmatpush3.bf16.msra.mxu1 %v2063_v25 }
 0x1ea   :  { %2034 = vmatprep.subr.bf16.mxu0 %v2033_v27  ;;  %2066 = vmatprep.subr.bf16.mxu1 %v2065_v28  ;;  %v1092_v28 = vsub.s32 1, %v2486_v51 }
 0x1ec   :  { %v1093_v34 = vrot.slane %v2492_v53, %v1092_v28 }
 0x1ed   :  { %2036 = vmatpush3.bf16.msra.mxu0 %v2035_v32  ;;  %2068 = vmatpush3.bf16.msra.mxu1 %v2067_v33 }
 0x1ee   :  { %2069 = vmatprep.subr.bf16.mxu0 %v2333_v37  ;;  %2093 = vmatprep.subr.bf16.mxu1 %v2333_v37 }
 0x1f0   :  { %981 = vmatmul.mubr.f32.vlgmr.msra.gmra.mrb[6].mxu0 %v2498_v15  ;;  %1084 = vmatmul.mubr.f32.vlgmr.msra.gmra.mrb[6].mxu1 %v2498_v15  ;;  %v1102_v15 = vld [vmem:[#allocation8 + $0x30] sm:$0xff] }
 0x1f1   :  { %2071 = vmatpush3.bf16.msra.mxu0 %v2070_v38  ;;  %v2079_v45 = vpack.c.bf16 %v1103_v44, %v1102_v15  ;;  %1612 = vmatprep.mubr.msk.f32.mxu0 %vm2334_vm0, %v2335_v59  ;;  %v1280_v15 = vld [vmem:[#allocation11 + $0x10] sm:$0xff] }
 0x1f2   :  { %2072 = vmatprep.subr.bf16.mxu0 %v2333_v37  ;;  %1647 = vmatprep.mubr.msk.f32.mxu1 %vm2334_vm0, %v2335_v59 }
 0x1f3   :  { %2095 = vmatpush3.bf16.msra.mxu1 %v2094_v63  ;;  %v1114_v63 = vsub.s32 2, %v2486_v51 }
 0x1f4   :  { %2096 = vmatprep.subr.bf16.mxu1 %v2333_v37 }
 0x1f5   :  { %2074 = vmatpush3.bf16.msra.mxu0 %v2073_v40  ;;  %v1202_v40 = vld [vmem:[#allocation10 + $0x78] sm:$0xff]  ;;  %v1115_v0 = vrot.slane %v2492_v53, %v1114_v63 }
 0x1f6   :  { %2075 = vmatprep.subr.bf16.mxu0 %v2333_v37  ;;  %v2115_v41 = vpack.c.bf16 %v1202_v40, %v1201_v39 }
 0x1f7   :  { %2098 = vmatpush3.bf16.msra.mxu1 %v2097_v1 }
 0x1f8   :  { %2099 = vmatprep.subr.bf16.mxu1 %v2333_v37 }
 0x1f9   :  { %2077 = vmatpush3.bf16.msra.mxu0 %v2076_v43  ;;  %v1279_v43 = vld [vmem:[#allocation11 + $0x8] sm:$0xff] }
 0x1fa   :  { %2078 = vmatprep.subr.bf16.mxu0 %v2333_v37  ;;  %v2118_v44 = vpack.c.bf16 %v1279_v43, %v1278_v42 }
 0x1fb   :  { %2101 = vmatpush3.bf16.msra.mxu1 %v2100_v4 }
 0x1fc   :  { %2102 = vmatprep.subr.bf16.mxu1 %v2333_v37 }
 0x1fd   :  { %2080 = vmatpush3.bf16.msra.mxu0 %v2079_v45  ;;  %v1281_v45 = vld [vmem:[#allocation11 + $0x18] sm:$0xff] }
 0x1fe   :  { %2081 = vmatprep.subr.bf16.mxu0 %v2333_v37  ;;  %v2121_v46 = vpack.c.bf16 %v1281_v45, %v1280_v15 }
 0x1ff   :  { %2104 = vmatpush3.bf16.msra.mxu1 %v2103_v7  ;;  %v2139_v7 = vpack.c.bf16 %v1293_v6, %v1292_v5 }
 0x200   :  { %2105 = vmatprep.subr.bf16.mxu1 %v2333_v37 }
 0x201   :  { %2083 = vmatpush3.bf16.msra.mxu0 %v2082_v48  ;;  %v1283_v48 = vld [vmem:[#allocation11 + $0x28] sm:$0xff] }
 0x202   :  { %2084 = vmatprep.subr.bf16.mxu0 %v2333_v37  ;;  %v2124_v49 = vpack.c.bf16 %v1283_v48, %v1282_v47 }
 0x203   :  { %2107 = vmatpush3.bf16.msra.mxu1 %v2106_v10 }
 0x204   :  { %2108 = vmatprep.subr.bf16.mxu1 %v2333_v37 }
 0x205   :  { %2086 = vmatpush3.bf16.msra.mxu0 %v2085_v52  ;;  %v1285_v52 = vld [vmem:[#allocation11 + $0x38] sm:$0xff] }
 0x206   :  { %2087 = vmatprep.subr.bf16.mxu0 %v2333_v37  ;;  %v2127_v54 = vpack.c.bf16 %v1285_v52, %v1284_v50 }
 0x207   :  { %2110 = vmatpush3.bf16.msra.mxu1 %v2109_v13  ;;  %v1296_v13 = vsub.s32 4, %v2486_v51 }
 0x208   :  { %2111 = vmatprep.subr.bf16.mxu1 %v2333_v37 }
 0x209   :  { %2089 = vmatpush3.bf16.msra.mxu0 %v2088_v55  ;;  %v1287_v55 = vld [vmem:[#allocation11 + $0x48] sm:$0xff]  ;;  %v1297_v14 = vrot.slane %v2492_v53, %v1296_v13 }
 0x20a   :  { %2090 = vmatprep.subr.bf16.mxu0 %v2333_v37  ;;  %v2130_v56 = vpack.c.bf16 %v1287_v55, %v1286_v19 }
 0x20b   :  { %2113 = vmatpush3.bf16.msra.mxu1 %v2112_v18 }
 0x20c   :  { %2114 = vmatprep.subr.bf16.mxu1 %v2333_v37 }
 0x20d   :  { %2092 = vmatpush3.bf16.msra.mxu0 %v2091_v58  ;;  %v1289_v58 = vld [vmem:[#allocation11 + $0x58] sm:$0xff] }
 0x20e   :  { %2117 = vmatprep.subr.bf16.mxu0 %v2333_v37 }
 0x20f   :  { %2116 = vmatpush3.bf16.msra.mxu1 %v2115_v41 }
 0x2a3   :  { %v1421_v20 = vpop.f32.mrb[4].mxu0  ;;  %v1456_v21 = vpop.f32.mrb[4].mxu1 }
 0x2a4   :  { %v1422_v22 = vpop.f32.mrb[5].mxu0  ;;  %v1457_v16 = vpop.f32.mrb[5].mxu1 }
 0x2a5   :  { %v1423_v23 = vadd.f32 %v1422_v22, %v1421_v20  ;;  %v1458_v24 = vadd.f32 %v1457_v16, %v1456_v21 }
 0x2a7   :  { %v883_v25 = vmax.f32 %v1423_v23, %v1458_v24 }
 0x2c3   :  { %v1491_v26 = vpop.f32.mrb[6].mxu0  ;;  %v1526_v27 = vpop.f32.mrb[6].mxu1 }
 0x2c4   :  { %v1492_v29 = vpop.f32.mrb[7].mxu0  ;;  %v1527_v30 = vpop.f32.mrb[7].mxu1 }
 0x2c5   :  { %v1493_v31 = vadd.f32 %v1492_v29, %v1491_v26  ;;  %v1528_v32 = vadd.f32 %v1527_v30, %v1526_v27 }
 0x2c7   :  { %v986_v33 = vmax.f32 %v883_v25, %v1493_v31 }
 0x2c9   :  { %v1089_v35 = vmax.f32 %v986_v33, %v1528_v32 }
 0x2cb   :  { %v1094_v36 = vadd.f32 %v1093_v34, %v1089_v35 }
 0x2cd   :  { %v1095_v38 = vmax.f32 %v1094_v36, 0.0 }
 0x2cf   :  { %1613 = vmatmul.mubr.f32.vlgmr.msra.gmra.mrb[8].mxu0 %v1095_v38 }
 0x2d0   :  { %1682 = vmatprep.mubr.msk.f32.mxu0 %vm2334_vm0, %v2335_v59  ;;  %2119 = vmatpush3.bf16.msra.mxu0 %v2118_v44  ;;  %v2133_v59 = vpack.c.bf16 %v1289_v58, %v1288_v57 }
 0x2d1   :  { %2120 = vmatprep.subr.bf16.mxu0 %v2333_v37 }
 0x2d4   :  { %2122 = vmatpush3.bf16.msra.mxu0 %v2121_v46 }
 0x2d5   :  { %2123 = vmatprep.subr.bf16.mxu0 %v2333_v37 }
 0x2d8   :  { %2125 = vmatpush3.bf16.msra.mxu0 %v2124_v49 }
 0x2d9   :  { %2126 = vmatprep.subr.bf16.mxu0 %v2333_v37 }
 0x2dc   :  { %2128 = vmatpush3.bf16.msra.mxu0 %v2127_v54 }
 0x2dd   :  { %2129 = vmatprep.subr.bf16.mxu0 %v2333_v37 }
 0x2e0   :  { %2131 = vmatpush3.bf16.msra.mxu0 %v2130_v56 }
 0x2e1   :  { %2132 = vmatprep.subr.bf16.mxu0 %v2333_v37 }
 0x2e4   :  { %2134 = vmatpush3.bf16.msra.mxu0 %v2133_v59 }
 0x2e5   :  { %2135 = vmatprep.subr.bf16.mxu0 %v2333_v37 }
 0x2e8   :  { %2137 = vmatpush3.bf16.msra.mxu0 %v2136_v62 }
 0x2e9   :  { %2138 = vmatprep.subr.bf16.mxu0 %v2333_v37 }
 0x2ec   :  { %2140 = vmatpush3.bf16.msra.mxu0 %v2139_v7 }
 0x3a2   :  { %v1182_v1 = vpop.f32.mrb[8].mxu0 }
 0x3a3   :  { %v1183_v2 = vadd.f32 %v1182_v1, %v1115_v0  ;;  %v1614_v3 = vpop.f32.mrb[9].mxu0 }
 0x3a5   :  { %v1186_v4 = vmax.f32 %v1183_v2, 0.0 }
 0x3a7   :  { %1648 = vmatmul.mubr.f32.vlgmr.msra.gmra.mrb[8].mxu1 %v1186_v4 }
 0x47a   :  { %v1273_v10 = vpop.f32.mrb[8].mxu1 }
 0x47b   :  { %v1274_v11 = vadd.f32 %v1273_v10, %v1206_v9  ;;  %v1649_v37 = vpop.f32.mrb[9].mxu1 }
 0x47d   :  { %v1277_v12 = vmax.f32 %v1274_v11, 0.0 }
 0x47f   :  { %1683 = vmatmul.mubr.f32.vlgmr.msra.gmra.mrb[10].mxu0 %v1277_v12 }
 0x552   :  { %v1364_v17 = vpop.f32.mrb[10].mxu0 }
 0x553   :  { %v1365_v18 = vadd.f32 %v1364_v17, %v1297_v14  ;;  %v1684_v20 = vpop.f32.mrb[11].mxu0 }
 0x555   :  { %v1368_v21 = vmax.f32 %v1365_v18, 0.0 }
 0x557   :  { %1369 = vst [vmem:[#allocation13] sm:$0x3] %v1368_v21 }
 0x558   :  { %2300 = shalt.err (!%p2297_p10)
}
 0x559   :  { %s2301_s11 = scalar_lea.hbm %s2558_s7, 32 }
 0x55a   :  { %p2302_p11 = scmp.ne.s32.totalorder %s2558_s7, %s2301_s11  ;;  %p2305_p12 = scmp.lt.u32.totalorder %s2301_s11, %s2558_s7 }
 0x55c   :  { %p2307_p13 = pnand %p2305_p12, %p2302_p11 }
 0x55e   :  { %2310 = shalt.err (!%p2307_p13)
}
 0x55f   :  { %1379 = dma.vmem_to_hbm [thread:$0]  %s1377_s29, 32, %s2558_s7, [#allocation4]  }
 0x560   :  { %2319 = dma.done.wait [#allocation4], 32  }
 0x561   :  { %2320 = vsyncadd [#allocation4], 4294967264 }
 0x562   :  { %1383 = vsyncpa [#allocation3], 1 }
 0x563   :  { %1384 = vsyncpa [#allocation6], 1 }
 0x564   :  { %1385 = vsyncpa [#allocation9], 1 }
 0x565   :  { %1386 = vsyncpa [#allocation12], 1 }
 0x566   :  { %1387 = vsyncpa [#allocation4], 1 }

</bundles_post_ra>
